<compile_context>
chip_gen: v7x
topology: tpu7x:2x2x1
jax: 0.10.0
libtpu: 0.0.40
codegen_flags: <defaults>
</compile_context>

<pallas_src>
import math

import numpy as np
import jax
import jax.numpy as jnp
from jax.experimental import pallas as pl
from jax.experimental.pallas import tpu as pltpu


# ----------------------------------------------------------------------------------------------
# Kernel: one broadcasting add per output element.  y_ref and x_ref broadcast along different
# axes; exactly one of them is nonzero for any given channel, so the add reconstructs the
# per-channel row/column select with no compare, no iota and no transcendental on the big tensor.
# ----------------------------------------------------------------------------------------------
def _add_tables_kernel(y_ref, x_ref, o_ref):
    o_ref[...] = (y_ref[...] + x_ref[...]).astype(o_ref.dtype)


def _round_up(n, m):
    return ((n + m - 1) // m) * m


def _choose_tile_h(H, per_row_padded_bytes, target_bytes=6 * 1024 * 1024):
    """Pick a row-tile: ~target-sized blocks, multiple of 8, and >=2 grid steps when H > 8."""
    tile_h = max(1, min(H, target_bytes // max(per_row_padded_bytes, 1)))
    if tile_h >= H and H > 8:
        tile_h = (H + 1) // 2          # keep >= 2 grid steps so both v7x TensorCores get work
    if tile_h < H:
        tile_h = max(8, (tile_h // 8) * 8)   # second-minor block dim must be a multiple of 8
        tile_h = min(tile_h, H)
    return tile_h


def _sine_tables(H, W, F, temperature, normalize, scale):
    """Trace-time (NumPy) factorized tables: y_tab (H, 2F), x_tab (W, 2F), channel-masked."""
    f = np.arange(F, dtype=np.float64)
    inv_dim_t = np.exp(-(2.0 * np.floor(f / 2.0) / F) * math.log(float(temperature)))
    phase = np.where(np.arange(F) % 2 == 0, 0.0, np.pi / 2.0)     # even -> sin, odd -> cos
    if normalize:
        eps = 1e-06
        y_scale = float(scale) / (float(H) + eps)
        x_scale = float(scale) / (float(W) + eps)
    else:
        y_scale = 1.0
        x_scale = 1.0
    rows = np.arange(1, H + 1, dtype=np.float64)[:, None]          # cumsum of ones over rows
    cols = np.arange(1, W + 1, dtype=np.float64)[:, None]          # cumsum of ones over cols
    y_half = np.sin(rows * (y_scale * inv_dim_t)[None, :] + phase[None, :])   # (H, F)
    x_half = np.sin(cols * (x_scale * inv_dim_t)[None, :] + phase[None, :])   # (W, F)
    C = 2 * F
    y_tab = np.zeros((H, C), np.float32)
    x_tab = np.zeros((W, C), np.float32)
    y_tab[:, :F] = y_half                                           # first F channels: y part
    x_tab[:, F:] = x_half                                           # last  F channels: x part
    return y_tab, x_tab


def position_embedding_sine(x, num_pos_feats=64, temperature=10000, normalize=False,
                            scale=None, channels_last=False, out_dtype=jnp.float32):
    """JAX/Pallas equivalent of PositionEmbeddingSine.forward(x).

    x: (B, C, H, W) NCHW array (values are unused; only the spatial shape matters).
    Returns: (1, 2*num_pos_feats, H, W) in out_dtype (PyTorch layout, no transpose pass), or
             (1, H, W, 2*num_pos_feats) if channels_last=True (lane-dense channel axis).
    """
    if scale is not None and normalize is False:
        raise ValueError('normalize should be True if scale is passed')
    if scale is None:
        scale = 2 * math.pi

    _, _, H, W = x.shape
    F = int(num_pos_feats)
    C = 2 * F
    itemsize = np.dtype(out_dtype).itemsize

    y_tab, x_tab = _sine_tables(H, W, F, temperature, normalize, scale)

    cost = pl.CostEstimate(
        flops=H * W * C,                                   # one add per output element
        transcendentals=0,                                 # sin fully hoisted to trace time
        bytes_accessed=H * W * C * itemsize + (H + W) * C * 4)

    cparams = pltpu.CompilerParams(
        dimension_semantics=("parallel",),
        vmem_limit_bytes=32 * 1024 * 1024)

    if not channels_last:
        # ---- direct NCHW output: (C, H, W), no post-kernel transpose --------------------------
        y_in = jnp.asarray(np.ascontiguousarray(y_tab.T)[:, :, None])   # (C, H, 1)
        x_in = jnp.asarray(np.ascontiguousarray(x_tab.T)[:, None, :])   # (C, 1, W)

        w_pad = _round_up(W, 128)
        per_row = C * w_pad * itemsize + C * 128 * 4        # padded output + y-table per h row
        tile_h = _choose_tile_h(H, per_row)
        grid = (pl.cdiv(H, tile_h),)

        out = pl.pallas_call(
            _add_tables_kernel,
            out_shape=jax.ShapeDtypeStruct((C, H, W), out_dtype),
            grid=grid,
            in_specs=[pl.BlockSpec((C, tile_h, 1), lambda i: (0, i, 0)),
                      pl.BlockSpec((C, 1, W), lambda i: (0, 0, 0))],
            out_specs=pl.BlockSpec((C, tile_h, W), lambda i: (0, i, 0)),
            compiler_params=cparams,
            cost_estimate=cost,
        )(y_in, x_in)
        return out[None]                                    # (1, C, H, W) -- free reshape

    # ---- channels-last output: (H, W, C), lane-dense (C on lanes) -----------------------------
    y_in = jnp.asarray(y_tab[:, None, :])                   # (H, 1, C)
    x_in = jnp.asarray(x_tab[None, :, :])                   # (1, W, C)

    c_pad = _round_up(C, 128)
    per_row = _round_up(W, 8) * c_pad * itemsize + 8 * c_pad * 4
    tile_h = _choose_tile_h(H, per_row)
    grid = (pl.cdiv(H, tile_h),)

    out = pl.pallas_call(
        _add_tables_kernel,
        out_shape=jax.ShapeDtypeStruct((H, W, C), out_dtype),
        grid=grid,
        in_specs=[pl.BlockSpec((tile_h, 1, C), lambda i: (i, 0, 0)),
                  pl.BlockSpec((1, W, C), lambda i: (0, 0, 0))],
        out_specs=pl.BlockSpec((tile_h, W, C), lambda i: (i, 0, 0)),
        compiler_params=cparams,
        cost_estimate=cost,
    )(y_in, x_in)
    return out[None]                                        # (1, H, W, C)


# ----------------------------------------------------------------------------------------------
# Pure-JAX reference mirroring the PyTorch forward, for correctness checks.
# ----------------------------------------------------------------------------------------------
def _reference(x, num_pos_feats=64, temperature=10000, normalize=False, scale=None):
    if scale is None:
        scale = 2 * math.pi
    _, _, H, W = x.shape
    not_mask = jnp.ones((1, H, W), jnp.float32)
    y_embed = jnp.cumsum(not_mask, axis=1)
    x_embed = jnp.cumsum(not_mask, axis=2)
    if normalize:
        eps = 1e-06
        y_embed = y_embed / (y_embed[:, -1:, :] + eps) * scale
        x_embed = x_embed / (x_embed[:, :, -1:] + eps) * scale
    dim_t = jnp.arange(num_pos_feats, dtype=jnp.float32)
    dim_t = jnp.exp((2 * jnp.floor(dim_t / 2) / num_pos_feats) *
                    jnp.float32(math.log(temperature)))
    pos_x = x_embed[:, :, :, None] / dim_t
    pos_y = y_embed[:, :, :, None] / dim_t
    pos_x = jnp.stack((jnp.sin(pos_x[:, :, :, 0::2]),
                       jnp.cos(pos_x[:, :, :, 1::2])), axis=4).reshape(1, H, W, -1)
    pos_y = jnp.stack((jnp.sin(pos_y[:, :, :, 0::2]),
                       jnp.cos(pos_y[:, :, :, 1::2])), axis=4).reshape(1, H, W, -1)
    pos = jnp.concatenate((pos_y, pos_x), axis=3)
    return jnp.transpose(pos, (0, 3, 1, 2))


if __name__ == "__main__":
    key = jax.random.PRNGKey(0)
    # Small NCHW input consistent with the module (values are irrelevant to the output).
    x = jax.random.normal(key, (2, 4, 16, 16), dtype=jnp.float32)

    # normalize=False path (default PyTorch NCHW layout, written directly by the kernel)
    out = jax.block_until_ready(
        position_embedding_sine(x, num_pos_feats=64, temperature=10000, normalize=False))
    assert out.shape == (1, 128, 16, 16), out.shape
    assert out.dtype == jnp.float32, out.dtype
    ref = jax.block_until_ready(_reference(x))
    assert jnp.allclose(out, ref, atol=1e-4, rtol=1e-4), \
        float(jnp.max(jnp.abs(out - ref)))

    # normalize=True path
    out_n = jax.block_until_ready(
        position_embedding_sine(x, num_pos_feats=64, temperature=10000, normalize=True))
    ref_n = jax.block_until_ready(
        _reference(x, num_pos_feats=64, temperature=10000, normalize=True))
    assert jnp.allclose(out_n, ref_n, atol=1e-4, rtol=1e-4), \
        float(jnp.max(jnp.abs(out_n - ref_n)))

    # channels-last variant agrees with the NCHW result
    out_cl = jax.block_until_ready(position_embedding_sine(x, channels_last=True))
    assert out_cl.shape == (1, 16, 16, 128), out_cl.shape
    assert jnp.allclose(jnp.transpose(out_cl, (0, 3, 1, 2)), out, atol=1e-6)

    print("KERNEL_OK")
</pallas_src>

<mosaic_0001>
module attributes {stable_mosaic.version = 11 : i64} {
  func.func @_add_tables_kernel(%arg0: i32, %arg1: memref<128x8x1xf32, #tpu.memory_space<vmem>>, %arg2: memref<128x1x16xf32, #tpu.memory_space<vmem>>, %arg3: memref<128x8x16xf32, #tpu.memory_space<vmem>>) attributes {dimension_semantics = [#tpu.dimension_semantics<parallel>], iteration_bounds = array<i64: 2>, scalar_prefetch = 0 : i64, scratch_operands = 0 : i64, tpu.core_type = #tpu.core_type<tc>, window_params = [{transform_indices = @transform_0, window_bounds = array<i64: 128, 8, 1>}, {pipeline_mode = #tpu.pipeline_mode<synchronous>, transform_indices = @transform_1, window_bounds = array<i64: 128, 1, 16>}, {transform_indices = @transform_2, window_bounds = array<i64: 128, 8, 16>}]} {
    %c0 = arith.constant 0 : index
    %c0_0 = arith.constant 0 : index
    %c0_1 = arith.constant 0 : index
    %0 = vector.load %arg1[%c0, %c0_0, %c0_1] : memref<128x8x1xf32, #tpu.memory_space<vmem>>, vector<128x8x1xf32>
    %c0_2 = arith.constant 0 : index
    %c0_3 = arith.constant 0 : index
    %c0_4 = arith.constant 0 : index
    %1 = vector.load %arg2[%c0_2, %c0_3, %c0_4] : memref<128x1x16xf32, #tpu.memory_space<vmem>>, vector<128x1x16xf32>
    %2 = vector.broadcast %0 : vector<128x8x1xf32> to vector<128x8x16xf32>
    %3 = vector.broadcast %1 : vector<128x1x16xf32> to vector<128x8x16xf32>
    %4 = arith.addf %2, %3 : vector<128x8x16xf32>
    %c0_5 = arith.constant 0 : index
    %c0_6 = arith.constant 0 : index
    %c0_7 = arith.constant 0 : index
    %5 = vector.load %arg3[%c0_5, %c0_6, %c0_7] : memref<128x8x16xf32, #tpu.memory_space<vmem>>, vector<128x8x16xf32>
    tpu.vector_store %arg3[%c0_5, %c0_6, %c0_7], %4 {strides = array<i32>} : memref<128x8x16xf32, #tpu.memory_space<vmem>>, vector<128x8x16xf32>,
    return
  }
  func.func @transform_0(%arg0: i32) -> (i32, i32, i32) {
    %c0_i32 = arith.constant 0 : i32
    %c0_i32_0 = arith.constant 0 : i32
    %c0_i32_1 = arith.constant 0 : i32
    return %c0_i32, %arg0, %c0_i32_0 : i32, i32, i32
  }
  func.func @transform_1(%arg0: i32) -> (i32, i32, i32) {
    %c0_i32 = arith.constant 0 : i32
    %c0_i32_0 = arith.constant 0 : i32
    %c0_i32_1 = arith.constant 0 : i32
    %c0_i32_2 = arith.constant 0 : i32
    return %c0_i32, %c0_i32_0, %c0_i32_1 : i32, i32, i32
  }
  func.func @transform_2(%arg0: i32) -> (i32, i32, i32) {
    %c0_i32 = arith.constant 0 : i32
    %c0_i32_0 = arith.constant 0 : i32
    %c0_i32_1 = arith.constant 0 : i32
    return %c0_i32, %arg0, %c0_i32_0 : i32, i32, i32
  }
}

</mosaic_0001>

<bundles_post_ra>
// kernel: tpu_custom_call.1
= control target key start
LH: loop header
LB: loop body
LE: loop exit
PB: predicated region body
PF: predicated region fallthrough
CT: control target
= control target key end

     0   :  { %s3414_s9 = smov 0   ;;  %s3416_s10 = smov 0   ;;  %s4768_s0 = inlined_call_operand.vmem [shape: f32[128,16,1], index: 0, kind: input, shape index: {}]   ;;  %s4769_s1 = inlined_call_operand.vmem [shape: f32[128,1,16], index: 1, kind: input, shape index: {}]   ;;  %s4770_s2 = inlined_call_operand.vmem [shape: f32[128,16,16], index: 2, kind: output, shape index: {}]  }
   0x1   :  { %s3418_s11 = smov 0  }
   0x2 LB: > { %s3206_s12 = sadd.s32 4294967295, %s3396_s11   ;;  %s3431_s13 = sadd.s32 1, %s3396_s11   ;;  %s3396_s11 = sphi %s3418_s11, %s4774_s11   ;;  %s3392_s10 = sphi %s3416_s10, %s4773_s10   ;;  %s3388_s9 = sphi %s3414_s9, %s4772_s9  }
   0x3   : > { %s16_s14 = ssub.s32 %s3396_s11, %s3431_s13  ;;  %s19_s15 = sadd.s32 1, %s3392_s10 }
   0x4   : > { %p17_p0 = scmp.eq.s32.totalorder %s16_s14, 0  ;;  %p26_p1 = scmp.ne.s32.totalorder %s3392_s10, %s3388_s9 }
   0x5   : > { %p27_p2 = scmp.eq.s32.totalorder %s3396_s11, 0  ;;  %p77_p3 = scmp.eq.s32.totalorder %s3206_s12, 1 }
   0x6   : > { %s3442_s16 = scalar_select %p17_p0, %s3392_s10, %s19_s15  }
   0x7   : > { %p28_p4 = por %p27_p2, %p26_p1  ;;  %p3444_p5 = por %p77_p3, %p26_p1 }
   0x8   : > { %p3209_p6 = scmp.ge.s32.totalorder %s3396_s11, 2 }
   0xa   : > { %102 = sbr.rel (%p3209_p6) target bundleno = 85 (0x55), region = 20 }
  0x11   : > { %105 = sbr.rel (!%p28_p4) target bundleno = 85 (0x55), region = 24  ;;  %s107_s18 = sand.u32 (%p28_p4), 1, %s3392_s10  }
  0x12   : > { %s3211_s19 = sshll.u32 (%p28_p4), %s3396_s11, 3  ;;  %s3210_s20 = sshll.u32 (%p28_p4), %s107_s18, 10 }
  0x13   : > { %s3454_s23 = scalar_lea.vmem (%p28_p4), %s4768_s0, %s3211_s19  ;;  %s3459_s24 = scalar_lea.vmem (%p28_p4), [#allocation2], %s3210_s20 }
  0x14   : > { %v393_v0 = vld [vmem:[%s3454_s23] sm:$0xff] (%p28_p4)  ;;  %v395_v1 = vld [vmem:[%s3454_s23 + $0x10] sm:$0xff] (%p28_p4) }
  0x15   : > { %v397_v2 = vld [vmem:[%s3454_s23 + $0x20] sm:$0xff] (%p28_p4)  ;;  %394 = vst [vmem:[%s3459_s24] sm:$0xff] (%p28_p4), %v393_v0  ;;  %396 = vst [vmem:[%s3459_s24 + $0x8] sm:$0xff] (%p28_p4), %v395_v1  ;;  %v399_v3 = vld [vmem:[%s3454_s23 + $0x30] sm:$0xff] (%p28_p4) }
  0x16   : > { %398 = vst [vmem:[%s3459_s24 + $0x10] sm:$0xff] (%p28_p4), %v397_v2  ;;  %v401_v4 = vld [vmem:[%s3454_s23 + $0x40] sm:$0xff] (%p28_p4)  ;;  %v403_v5 = vld [vmem:[%s3454_s23 + $0x50] sm:$0xff] (%p28_p4)  ;;  %400 = vst [vmem:[%s3459_s24 + $0x18] sm:$0xff] (%p28_p4), %v399_v3 }
  0x17   : > { %402 = vst [vmem:[%s3459_s24 + $0x20] sm:$0xff] (%p28_p4), %v401_v4  ;;  %404 = vst [vmem:[%s3459_s24 + $0x28] sm:$0xff] (%p28_p4), %v403_v5  ;;  %v405_v6 = vld [vmem:[%s3454_s23 + $0x60] sm:$0xff] (%p28_p4)  ;;  %v407_v7 = vld [vmem:[%s3454_s23 + $0x70] sm:$0xff] (%p28_p4) }
  0x18   : > { %v409_v8 = vld [vmem:[%s3454_s23 + $0x80] sm:$0xff]  ;;  %406 = vst [vmem:[%s3459_s24 + $0x30] sm:$0xff] %v405_v6  ;;  %408 = vst [vmem:[%s3459_s24 + $0x38] sm:$0xff] %v407_v7  ;;  %v411_v9 = vld [vmem:[%s3454_s23 + $0x90] sm:$0xff] }
  0x19   : > { %410 = vst [vmem:[%s3459_s24 + $0x40] sm:$0xff] %v409_v8  ;;  %v413_v10 = vld [vmem:[%s3454_s23 + $0xa0] sm:$0xff]  ;;  %v415_v11 = vld [vmem:[%s3454_s23 + $0xb0] sm:$0xff]  ;;  %412 = vst [vmem:[%s3459_s24 + $0x48] sm:$0xff] %v411_v9 }
  0x1a   : > { %414 = vst [vmem:[%s3459_s24 + $0x50] sm:$0xff] %v413_v10  ;;  %416 = vst [vmem:[%s3459_s24 + $0x58] sm:$0xff] %v415_v11  ;;  %v417_v12 = vld [vmem:[%s3454_s23 + $0xc0] sm:$0xff]  ;;  %v419_v13 = vld [vmem:[%s3454_s23 + $0xd0] sm:$0xff] }
  0x1b   : > { %v421_v14 = vld [vmem:[%s3454_s23 + $0xe0] sm:$0xff]  ;;  %418 = vst [vmem:[%s3459_s24 + $0x60] sm:$0xff] %v417_v12  ;;  %420 = vst [vmem:[%s3459_s24 + $0x68] sm:$0xff] %v419_v13  ;;  %v423_v15 = vld [vmem:[%s3454_s23 + $0xf0] sm:$0xff] }
  0x1c   : > { %422 = vst [vmem:[%s3459_s24 + $0x70] sm:$0xff] %v421_v14  ;;  %v425_v16 = vld [vmem:[%s3454_s23 + $0x100] sm:$0xff]  ;;  %v427_v17 = vld [vmem:[%s3454_s23 + $0x110] sm:$0xff]  ;;  %424 = vst [vmem:[%s3459_s24 + $0x78] sm:$0xff] %v423_v15 }
  0x1d   : > { %426 = vst [vmem:[%s3459_s24 + $0x80] sm:$0xff] %v425_v16  ;;  %428 = vst [vmem:[%s3459_s24 + $0x88] sm:$0xff] %v427_v17  ;;  %v429_v18 = vld [vmem:[%s3454_s23 + $0x120] sm:$0xff]  ;;  %v431_v19 = vld [vmem:[%s3454_s23 + $0x130] sm:$0xff] }
  0x1e   : > { %v433_v20 = vld [vmem:[%s3454_s23 + $0x140] sm:$0xff]  ;;  %430 = vst [vmem:[%s3459_s24 + $0x90] sm:$0xff] %v429_v18  ;;  %432 = vst [vmem:[%s3459_s24 + $0x98] sm:$0xff] %v431_v19  ;;  %v435_v21 = vld [vmem:[%s3454_s23 + $0x150] sm:$0xff] }
  0x1f   : > { %434 = vst [vmem:[%s3459_s24 + $0xa0] sm:$0xff] %v433_v20  ;;  %v437_v22 = vld [vmem:[%s3454_s23 + $0x160] sm:$0xff]  ;;  %v439_v23 = vld [vmem:[%s3454_s23 + $0x170] sm:$0xff]  ;;  %436 = vst [vmem:[%s3459_s24 + $0xa8] sm:$0xff] %v435_v21 }
  0x20   : > { %438 = vst [vmem:[%s3459_s24 + $0xb0] sm:$0xff] %v437_v22  ;;  %440 = vst [vmem:[%s3459_s24 + $0xb8] sm:$0xff] %v439_v23  ;;  %v441_v24 = vld [vmem:[%s3454_s23 + $0x180] sm:$0xff]  ;;  %v443_v25 = vld [vmem:[%s3454_s23 + $0x190] sm:$0xff] }
  0x21   : > { %v445_v26 = vld [vmem:[%s3454_s23 + $0x1a0] sm:$0xff]  ;;  %442 = vst [vmem:[%s3459_s24 + $0xc0] sm:$0xff] %v441_v24  ;;  %444 = vst [vmem:[%s3459_s24 + $0xc8] sm:$0xff] %v443_v25  ;;  %v447_v27 = vld [vmem:[%s3454_s23 + $0x1b0] sm:$0xff] }
  0x22   : > { %446 = vst [vmem:[%s3459_s24 + $0xd0] sm:$0xff] %v445_v26  ;;  %v449_v28 = vld [vmem:[%s3454_s23 + $0x1c0] sm:$0xff]  ;;  %v451_v29 = vld [vmem:[%s3454_s23 + $0x1d0] sm:$0xff]  ;;  %448 = vst [vmem:[%s3459_s24 + $0xd8] sm:$0xff] %v447_v27 }
  0x23   : > { %450 = vst [vmem:[%s3459_s24 + $0xe0] sm:$0xff] %v449_v28  ;;  %452 = vst [vmem:[%s3459_s24 + $0xe8] sm:$0xff] %v451_v29  ;;  %v453_v30 = vld [vmem:[%s3454_s23 + $0x1e0] sm:$0xff]  ;;  %v455_v31 = vld [vmem:[%s3454_s23 + $0x1f0] sm:$0xff] }
  0x24   : > { %v457_v32 = vld [vmem:[%s3454_s23 + $0x200] sm:$0xff]  ;;  %454 = vst [vmem:[%s3459_s24 + $0xf0] sm:$0xff] %v453_v30  ;;  %456 = vst [vmem:[%s3459_s24 + $0xf8] sm:$0xff] %v455_v31  ;;  %v459_v33 = vld [vmem:[%s3454_s23 + $0x210] sm:$0xff] }
  0x25   : > { %458 = vst [vmem:[%s3459_s24 + $0x100] sm:$0xff] %v457_v32  ;;  %v461_v34 = vld [vmem:[%s3454_s23 + $0x220] sm:$0xff]  ;;  %v463_v35 = vld [vmem:[%s3454_s23 + $0x230] sm:$0xff]  ;;  %460 = vst [vmem:[%s3459_s24 + $0x108] sm:$0xff] %v459_v33 }
  0x26   : > { %462 = vst [vmem:[%s3459_s24 + $0x110] sm:$0xff] %v461_v34  ;;  %464 = vst [vmem:[%s3459_s24 + $0x118] sm:$0xff] %v463_v35  ;;  %v465_v36 = vld [vmem:[%s3454_s23 + $0x240] sm:$0xff]  ;;  %v467_v37 = vld [vmem:[%s3454_s23 + $0x250] sm:$0xff] }
  0x27   : > { %v469_v38 = vld [vmem:[%s3454_s23 + $0x260] sm:$0xff]  ;;  %466 = vst [vmem:[%s3459_s24 + $0x120] sm:$0xff] %v465_v36  ;;  %468 = vst [vmem:[%s3459_s24 + $0x128] sm:$0xff] %v467_v37  ;;  %v471_v39 = vld [vmem:[%s3454_s23 + $0x270] sm:$0xff] }
  0x28   : > { %470 = vst [vmem:[%s3459_s24 + $0x130] sm:$0xff] %v469_v38  ;;  %v473_v40 = vld [vmem:[%s3454_s23 + $0x280] sm:$0xff]  ;;  %v475_v41 = vld [vmem:[%s3454_s23 + $0x290] sm:$0xff]  ;;  %472 = vst [vmem:[%s3459_s24 + $0x138] sm:$0xff] %v471_v39 }
  0x29   : > { %474 = vst [vmem:[%s3459_s24 + $0x140] sm:$0xff] %v473_v40  ;;  %476 = vst [vmem:[%s3459_s24 + $0x148] sm:$0xff] %v475_v41  ;;  %v477_v42 = vld [vmem:[%s3454_s23 + $0x2a0] sm:$0xff]  ;;  %v479_v43 = vld [vmem:[%s3454_s23 + $0x2b0] sm:$0xff] }
  0x2a   : > { %v481_v44 = vld [vmem:[%s3454_s23 + $0x2c0] sm:$0xff]  ;;  %478 = vst [vmem:[%s3459_s24 + $0x150] sm:$0xff] %v477_v42  ;;  %480 = vst [vmem:[%s3459_s24 + $0x158] sm:$0xff] %v479_v43  ;;  %v483_v45 = vld [vmem:[%s3454_s23 + $0x2d0] sm:$0xff] }
  0x2b   : > { %482 = vst [vmem:[%s3459_s24 + $0x160] sm:$0xff] %v481_v44  ;;  %v485_v46 = vld [vmem:[%s3454_s23 + $0x2e0] sm:$0xff]  ;;  %v487_v47 = vld [vmem:[%s3454_s23 + $0x2f0] sm:$0xff]  ;;  %484 = vst [vmem:[%s3459_s24 + $0x168] sm:$0xff] %v483_v45 }
  0x2c   : > { %486 = vst [vmem:[%s3459_s24 + $0x170] sm:$0xff] %v485_v46  ;;  %488 = vst [vmem:[%s3459_s24 + $0x178] sm:$0xff] %v487_v47  ;;  %v489_v48 = vld [vmem:[%s3454_s23 + $0x300] sm:$0xff]  ;;  %v491_v49 = vld [vmem:[%s3454_s23 + $0x310] sm:$0xff] }
  0x2d   : > { %v493_v50 = vld [vmem:[%s3454_s23 + $0x320] sm:$0xff]  ;;  %490 = vst [vmem:[%s3459_s24 + $0x180] sm:$0xff] %v489_v48  ;;  %492 = vst [vmem:[%s3459_s24 + $0x188] sm:$0xff] %v491_v49  ;;  %v495_v51 = vld [vmem:[%s3454_s23 + $0x330] sm:$0xff] }
  0x2e   : > { %494 = vst [vmem:[%s3459_s24 + $0x190] sm:$0xff] %v493_v50  ;;  %v497_v52 = vld [vmem:[%s3454_s23 + $0x340] sm:$0xff]  ;;  %v499_v53 = vld [vmem:[%s3454_s23 + $0x350] sm:$0xff]  ;;  %496 = vst [vmem:[%s3459_s24 + $0x198] sm:$0xff] %v495_v51 }
  0x2f   : > { %498 = vst [vmem:[%s3459_s24 + $0x1a0] sm:$0xff] %v497_v52  ;;  %500 = vst [vmem:[%s3459_s24 + $0x1a8] sm:$0xff] %v499_v53  ;;  %v501_v54 = vld [vmem:[%s3454_s23 + $0x360] sm:$0xff]  ;;  %v503_v55 = vld [vmem:[%s3454_s23 + $0x370] sm:$0xff] }
  0x30   : > { %v505_v56 = vld [vmem:[%s3454_s23 + $0x380] sm:$0xff]  ;;  %502 = vst [vmem:[%s3459_s24 + $0x1b0] sm:$0xff] %v501_v54  ;;  %504 = vst [vmem:[%s3459_s24 + $0x1b8] sm:$0xff] %v503_v55  ;;  %v507_v57 = vld [vmem:[%s3454_s23 + $0x390] sm:$0xff] }
  0x31   : > { %506 = vst [vmem:[%s3459_s24 + $0x1c0] sm:$0xff] %v505_v56  ;;  %v509_v58 = vld [vmem:[%s3454_s23 + $0x3a0] sm:$0xff]  ;;  %v511_v59 = vld [vmem:[%s3454_s23 + $0x3b0] sm:$0xff]  ;;  %508 = vst [vmem:[%s3459_s24 + $0x1c8] sm:$0xff] %v507_v57 }
  0x32   : > { %510 = vst [vmem:[%s3459_s24 + $0x1d0] sm:$0xff] %v509_v58  ;;  %512 = vst [vmem:[%s3459_s24 + $0x1d8] sm:$0xff] %v511_v59  ;;  %v513_v60 = vld [vmem:[%s3454_s23 + $0x3c0] sm:$0xff]  ;;  %v515_v61 = vld [vmem:[%s3454_s23 + $0x3d0] sm:$0xff] }
  0x33   : > { %v517_v62 = vld [vmem:[%s3454_s23 + $0x3e0] sm:$0xff]  ;;  %514 = vst [vmem:[%s3459_s24 + $0x1e0] sm:$0xff] %v513_v60  ;;  %516 = vst [vmem:[%s3459_s24 + $0x1e8] sm:$0xff] %v515_v61  ;;  %v519_v63 = vld [vmem:[%s3454_s23 + $0x3f0] sm:$0xff] }
  0x34   : > { %518 = vst [vmem:[%s3459_s24 + $0x1f0] sm:$0xff] %v517_v62  ;;  %v521_v0 = vld [vmem:[%s3454_s23 + $0x400] sm:$0xff]  ;;  %v523_v1 = vld [vmem:[%s3454_s23 + $0x410] sm:$0xff]  ;;  %520 = vst [vmem:[%s3459_s24 + $0x1f8] sm:$0xff] %v519_v63 }
  0x35   : > { %522 = vst [vmem:[%s3459_s24 + $0x200] sm:$0xff] %v521_v0  ;;  %524 = vst [vmem:[%s3459_s24 + $0x208] sm:$0xff] %v523_v1  ;;  %v525_v2 = vld [vmem:[%s3454_s23 + $0x420] sm:$0xff]  ;;  %v527_v3 = vld [vmem:[%s3454_s23 + $0x430] sm:$0xff] }
  0x36   : > { %v529_v4 = vld [vmem:[%s3454_s23 + $0x440] sm:$0xff]  ;;  %526 = vst [vmem:[%s3459_s24 + $0x210] sm:$0xff] %v525_v2  ;;  %528 = vst [vmem:[%s3459_s24 + $0x218] sm:$0xff] %v527_v3  ;;  %v531_v5 = vld [vmem:[%s3454_s23 + $0x450] sm:$0xff] }
  0x37   : > { %530 = vst [vmem:[%s3459_s24 + $0x220] sm:$0xff] %v529_v4  ;;  %v533_v6 = vld [vmem:[%s3454_s23 + $0x460] sm:$0xff]  ;;  %v535_v7 = vld [vmem:[%s3454_s23 + $0x470] sm:$0xff]  ;;  %532 = vst [vmem:[%s3459_s24 + $0x228] sm:$0xff] %v531_v5 }
  0x38   : > { %534 = vst [vmem:[%s3459_s24 + $0x230] sm:$0xff] %v533_v6  ;;  %536 = vst [vmem:[%s3459_s24 + $0x238] sm:$0xff] %v535_v7  ;;  %v537_v8 = vld [vmem:[%s3454_s23 + $0x480] sm:$0xff]  ;;  %v539_v9 = vld [vmem:[%s3454_s23 + $0x490] sm:$0xff] }
  0x39   : > { %v541_v10 = vld [vmem:[%s3454_s23 + $0x4a0] sm:$0xff]  ;;  %538 = vst [vmem:[%s3459_s24 + $0x240] sm:$0xff] %v537_v8  ;;  %540 = vst [vmem:[%s3459_s24 + $0x248] sm:$0xff] %v539_v9  ;;  %v543_v11 = vld [vmem:[%s3454_s23 + $0x4b0] sm:$0xff] }
  0x3a   : > { %542 = vst [vmem:[%s3459_s24 + $0x250] sm:$0xff] %v541_v10  ;;  %v545_v12 = vld [vmem:[%s3454_s23 + $0x4c0] sm:$0xff]  ;;  %v547_v13 = vld [vmem:[%s3454_s23 + $0x4d0] sm:$0xff]  ;;  %544 = vst [vmem:[%s3459_s24 + $0x258] sm:$0xff] %v543_v11 }
  0x3b   : > { %546 = vst [vmem:[%s3459_s24 + $0x260] sm:$0xff] %v545_v12  ;;  %548 = vst [vmem:[%s3459_s24 + $0x268] sm:$0xff] %v547_v13  ;;  %v549_v14 = vld [vmem:[%s3454_s23 + $0x4e0] sm:$0xff]  ;;  %v551_v15 = vld [vmem:[%s3454_s23 + $0x4f0] sm:$0xff] }
  0x3c   : > { %v553_v16 = vld [vmem:[%s3454_s23 + $0x500] sm:$0xff]  ;;  %550 = vst [vmem:[%s3459_s24 + $0x270] sm:$0xff] %v549_v14  ;;  %552 = vst [vmem:[%s3459_s24 + $0x278] sm:$0xff] %v551_v15  ;;  %v555_v17 = vld [vmem:[%s3454_s23 + $0x510] sm:$0xff] }
  0x3d   : > { %554 = vst [vmem:[%s3459_s24 + $0x280] sm:$0xff] %v553_v16  ;;  %v557_v18 = vld [vmem:[%s3454_s23 + $0x520] sm:$0xff]  ;;  %v559_v19 = vld [vmem:[%s3454_s23 + $0x530] sm:$0xff]  ;;  %556 = vst [vmem:[%s3459_s24 + $0x288] sm:$0xff] %v555_v17 }
  0x3e   : > { %558 = vst [vmem:[%s3459_s24 + $0x290] sm:$0xff] %v557_v18  ;;  %560 = vst [vmem:[%s3459_s24 + $0x298] sm:$0xff] %v559_v19  ;;  %v561_v20 = vld [vmem:[%s3454_s23 + $0x540] sm:$0xff]  ;;  %v563_v21 = vld [vmem:[%s3454_s23 + $0x550] sm:$0xff] }
  0x3f   : > { %v565_v22 = vld [vmem:[%s3454_s23 + $0x560] sm:$0xff]  ;;  %562 = vst [vmem:[%s3459_s24 + $0x2a0] sm:$0xff] %v561_v20  ;;  %564 = vst [vmem:[%s3459_s24 + $0x2a8] sm:$0xff] %v563_v21  ;;  %v567_v23 = vld [vmem:[%s3454_s23 + $0x570] sm:$0xff] }
  0x40   : > { %566 = vst [vmem:[%s3459_s24 + $0x2b0] sm:$0xff] %v565_v22  ;;  %v569_v24 = vld [vmem:[%s3454_s23 + $0x580] sm:$0xff]  ;;  %v571_v25 = vld [vmem:[%s3454_s23 + $0x590] sm:$0xff]  ;;  %568 = vst [vmem:[%s3459_s24 + $0x2b8] sm:$0xff] %v567_v23 }
  0x41   : > { %570 = vst [vmem:[%s3459_s24 + $0x2c0] sm:$0xff] %v569_v24  ;;  %572 = vst [vmem:[%s3459_s24 + $0x2c8] sm:$0xff] %v571_v25  ;;  %v573_v26 = vld [vmem:[%s3454_s23 + $0x5a0] sm:$0xff]  ;;  %v575_v27 = vld [vmem:[%s3454_s23 + $0x5b0] sm:$0xff] }
  0x42   : > { %v577_v28 = vld [vmem:[%s3454_s23 + $0x5c0] sm:$0xff]  ;;  %574 = vst [vmem:[%s3459_s24 + $0x2d0] sm:$0xff] %v573_v26  ;;  %576 = vst [vmem:[%s3459_s24 + $0x2d8] sm:$0xff] %v575_v27  ;;  %v579_v29 = vld [vmem:[%s3454_s23 + $0x5d0] sm:$0xff] }
  0x43   : > { %578 = vst [vmem:[%s3459_s24 + $0x2e0] sm:$0xff] %v577_v28  ;;  %v581_v30 = vld [vmem:[%s3454_s23 + $0x5e0] sm:$0xff]  ;;  %v583_v31 = vld [vmem:[%s3454_s23 + $0x5f0] sm:$0xff]  ;;  %580 = vst [vmem:[%s3459_s24 + $0x2e8] sm:$0xff] %v579_v29 }
  0x44   : > { %582 = vst [vmem:[%s3459_s24 + $0x2f0] sm:$0xff] %v581_v30  ;;  %584 = vst [vmem:[%s3459_s24 + $0x2f8] sm:$0xff] %v583_v31  ;;  %v585_v32 = vld [vmem:[%s3454_s23 + $0x600] sm:$0xff]  ;;  %v587_v33 = vld [vmem:[%s3454_s23 + $0x610] sm:$0xff] }
  0x45   : > { %v589_v34 = vld [vmem:[%s3454_s23 + $0x620] sm:$0xff]  ;;  %586 = vst [vmem:[%s3459_s24 + $0x300] sm:$0xff] %v585_v32  ;;  %588 = vst [vmem:[%s3459_s24 + $0x308] sm:$0xff] %v587_v33  ;;  %v591_v35 = vld [vmem:[%s3454_s23 + $0x630] sm:$0xff] }
  0x46   : > { %590 = vst [vmem:[%s3459_s24 + $0x310] sm:$0xff] %v589_v34  ;;  %v593_v36 = vld [vmem:[%s3454_s23 + $0x640] sm:$0xff]  ;;  %v595_v37 = vld [vmem:[%s3454_s23 + $0x650] sm:$0xff]  ;;  %592 = vst [vmem:[%s3459_s24 + $0x318] sm:$0xff] %v591_v35 }
  0x47   : > { %594 = vst [vmem:[%s3459_s24 + $0x320] sm:$0xff] %v593_v36  ;;  %596 = vst [vmem:[%s3459_s24 + $0x328] sm:$0xff] %v595_v37  ;;  %v597_v38 = vld [vmem:[%s3454_s23 + $0x660] sm:$0xff]  ;;  %v599_v39 = vld [vmem:[%s3454_s23 + $0x670] sm:$0xff] }
  0x48   : > { %v601_v40 = vld [vmem:[%s3454_s23 + $0x680] sm:$0xff]  ;;  %598 = vst [vmem:[%s3459_s24 + $0x330] sm:$0xff] %v597_v38  ;;  %600 = vst [vmem:[%s3459_s24 + $0x338] sm:$0xff] %v599_v39  ;;  %v603_v41 = vld [vmem:[%s3454_s23 + $0x690] sm:$0xff] }
  0x49   : > { %602 = vst [vmem:[%s3459_s24 + $0x340] sm:$0xff] %v601_v40  ;;  %v605_v42 = vld [vmem:[%s3454_s23 + $0x6a0] sm:$0xff]  ;;  %v607_v43 = vld [vmem:[%s3454_s23 + $0x6b0] sm:$0xff]  ;;  %604 = vst [vmem:[%s3459_s24 + $0x348] sm:$0xff] %v603_v41 }
  0x4a   : > { %606 = vst [vmem:[%s3459_s24 + $0x350] sm:$0xff] %v605_v42  ;;  %608 = vst [vmem:[%s3459_s24 + $0x358] sm:$0xff] %v607_v43  ;;  %v609_v44 = vld [vmem:[%s3454_s23 + $0x6c0] sm:$0xff]  ;;  %v611_v45 = vld [vmem:[%s3454_s23 + $0x6d0] sm:$0xff] }
  0x4b   : > { %v613_v46 = vld [vmem:[%s3454_s23 + $0x6e0] sm:$0xff]  ;;  %610 = vst [vmem:[%s3459_s24 + $0x360] sm:$0xff] %v609_v44  ;;  %612 = vst [vmem:[%s3459_s24 + $0x368] sm:$0xff] %v611_v45  ;;  %v615_v47 = vld [vmem:[%s3454_s23 + $0x6f0] sm:$0xff] }
  0x4c   : > { %614 = vst [vmem:[%s3459_s24 + $0x370] sm:$0xff] %v613_v46  ;;  %v617_v48 = vld [vmem:[%s3454_s23 + $0x700] sm:$0xff]  ;;  %v619_v49 = vld [vmem:[%s3454_s23 + $0x710] sm:$0xff]  ;;  %616 = vst [vmem:[%s3459_s24 + $0x378] sm:$0xff] %v615_v47 }
  0x4d   : > { %618 = vst [vmem:[%s3459_s24 + $0x380] sm:$0xff] %v617_v48  ;;  %620 = vst [vmem:[%s3459_s24 + $0x388] sm:$0xff] %v619_v49  ;;  %v621_v50 = vld [vmem:[%s3454_s23 + $0x720] sm:$0xff]  ;;  %v623_v51 = vld [vmem:[%s3454_s23 + $0x730] sm:$0xff] }
  0x4e   : > { %v625_v52 = vld [vmem:[%s3454_s23 + $0x740] sm:$0xff]  ;;  %622 = vst [vmem:[%s3459_s24 + $0x390] sm:$0xff] %v621_v50  ;;  %624 = vst [vmem:[%s3459_s24 + $0x398] sm:$0xff] %v623_v51  ;;  %v627_v53 = vld [vmem:[%s3454_s23 + $0x750] sm:$0xff] }
  0x4f   : > { %626 = vst [vmem:[%s3459_s24 + $0x3a0] sm:$0xff] %v625_v52  ;;  %v629_v54 = vld [vmem:[%s3454_s23 + $0x760] sm:$0xff]  ;;  %v631_v55 = vld [vmem:[%s3454_s23 + $0x770] sm:$0xff]  ;;  %628 = vst [vmem:[%s3459_s24 + $0x3a8] sm:$0xff] %v627_v53 }
  0x50   : > { %630 = vst [vmem:[%s3459_s24 + $0x3b0] sm:$0xff] %v629_v54  ;;  %632 = vst [vmem:[%s3459_s24 + $0x3b8] sm:$0xff] %v631_v55  ;;  %v633_v56 = vld [vmem:[%s3454_s23 + $0x780] sm:$0xff]  ;;  %v635_v57 = vld [vmem:[%s3454_s23 + $0x790] sm:$0xff] }
  0x51   : > { %v637_v58 = vld [vmem:[%s3454_s23 + $0x7a0] sm:$0xff]  ;;  %634 = vst [vmem:[%s3459_s24 + $0x3c0] sm:$0xff] %v633_v56  ;;  %636 = vst [vmem:[%s3459_s24 + $0x3c8] sm:$0xff] %v635_v57  ;;  %v639_v59 = vld [vmem:[%s3454_s23 + $0x7b0] sm:$0xff] }
  0x52   : > { %638 = vst [vmem:[%s3459_s24 + $0x3d0] sm:$0xff] %v637_v58  ;;  %v641_v60 = vld [vmem:[%s3454_s23 + $0x7c0] sm:$0xff]  ;;  %v643_v61 = vld [vmem:[%s3454_s23 + $0x7d0] sm:$0xff]  ;;  %640 = vst [vmem:[%s3459_s24 + $0x3d8] sm:$0xff] %v639_v59 }
  0x53   : > { %642 = vst [vmem:[%s3459_s24 + $0x3e0] sm:$0xff] %v641_v60  ;;  %644 = vst [vmem:[%s3459_s24 + $0x3e8] sm:$0xff] %v643_v61  ;;  %v645_v62 = vld [vmem:[%s3454_s23 + $0x7e0] sm:$0xff]  ;;  %v647_v63 = vld [vmem:[%s3454_s23 + $0x7f0] sm:$0xff] }
  0x54   : > { %646 = vst [vmem:[%s3459_s24 + $0x3f0] sm:$0xff] %v645_v62  ;;  %648 = vst [vmem:[%s3459_s24 + $0x3f8] sm:$0xff] %v647_v63 }
  0x55 PF: > { %p3212_p7 = scmp.ge.s32.totalorder %s3396_s11, 1  ;;  %p653_p8 = scmp.lt.s32.totalorder %s3396_s11, 3 }
  0x57   : > { %p654_p9 = pnand %p3212_p7, %p653_p8 }
  0x58   : > { %s660_s25 = sand.u32 (!%p654_p9), 1, %s3388_s9   ;;  %v3398_v0 = vmov (!%p654_p9), 0   ;;  %vm2472_vm0 = vcmask (!%p654_p9), 130048  }
  0x59   : > { %657 = sbr.rel (%p654_p9) target bundleno = 509 (0x1fd), region = 62  ;;  %3373 = vset.pattern.permute.xlu1 (!%p654_p9), %v3398_v0  ;;  %3372 = vset.pattern.permute.xlu0 (!%p654_p9), %v3398_v0  ;;  %s3717_s26 = sshll.u32 (!%p654_p9), %s660_s25, 10 }
  0x5a   : > { %s3720_s27 = scalar_lea.vmem (!%p654_p9), [#allocation2], %s3717_s26  ;;  %s3803_s8 = scalar_lea.vmem (!%p654_p9), [#allocation3], %s3717_s26 }
  0x5b   : > { %v682_v1 = vld [vmem:[%s3720_s27 + $0x10] sm:$0xff] (!%p654_p9)  ;;  %v680_v2 = vld [vmem:[%s3720_s27] sm:$0xff] (!%p654_p9)  ;;  %v683_v3 = vld [vmem:[%s3720_s27 + $0x18] sm:$0xff] (!%p654_p9) }
  0x5c   : > { %948 = vperm.xlu1 (!%p654_p9), %3373, %v682_v1   ;;  %938 = vperm.xlu0 (!%p654_p9), %3372, %v680_v2   ;;  %v681_v4 = vld [vmem:[%s3720_s27 + $0x8] sm:$0xff] (!%p654_p9)  ;;  %v684_v6 = vld [vmem:[%s3720_s27 + $0x20] sm:$0xff] (!%p654_p9)  ;;  %v687_v7 = vld [vmem:[%s3720_s27 + $0x38] sm:$0xff] (!%p654_p9) }
  0x5d   : > { %v685_v5 = vld [vmem:[%s3720_s27 + $0x28] sm:$0xff] (!%p654_p9)  ;;  %v686_v8 = vld [vmem:[%s3720_s27 + $0x30] sm:$0xff] (!%p654_p9)  ;;  %v688_v10 = vld [vmem:[%s3720_s27 + $0x40] sm:$0xff] (!%p654_p9) }
  0x5e   : > { %v689_v9 = vld [vmem:[%s3720_s27 + $0x48] sm:$0xff] (!%p654_p9)  ;;  %v691_v11 = vld [vmem:[%s3720_s27 + $0x58] sm:$0xff] (!%p654_p9)  ;;  %v690_v12 = vld [vmem:[%s3720_s27 + $0x50] sm:$0xff] (!%p654_p9) }
  0x5f   : > { %v693_v13 = vld [vmem:[%s3720_s27 + $0x68] sm:$0xff] (!%p654_p9)  ;;  %v692_v14 = vld [vmem:[%s3720_s27 + $0x60] sm:$0xff] (!%p654_p9)  ;;  %v695_v15 = vld [vmem:[%s3720_s27 + $0x78] sm:$0xff] (!%p654_p9) }
  0x60   : > { %953 = vperm.xlu1 %3373, %v683_v3   ;;  %943 = vperm.xlu0 %3372, %v681_v4   ;;  %v694_v16 = vld [vmem:[%s3720_s27 + $0x70] sm:$0xff]  ;;  %v697_v17 = vld [vmem:[%s3720_s27 + $0x88] sm:$0xff]  ;;  %v696_v18 = vld [vmem:[%s3720_s27 + $0x80] sm:$0xff]  ;;  %s3344_s15 = sshll.u32 (%p3444_p5), %s3206_s12, 3 }
  0x61   : > { %v699_v19 = vld [vmem:[%s3720_s27 + $0x98] sm:$0xff]  ;;  %v698_v20 = vld [vmem:[%s3720_s27 + $0x90] sm:$0xff]  ;;  %v701_v21 = vld [vmem:[%s3720_s27 + $0xa8] sm:$0xff]  ;;  %s4503_s17 = scalar_lea.vmem (%p3444_p5), %s4770_s2, %s3344_s15 }
  0x62   : > { %v700_v22 = vld [vmem:[%s3720_s27 + $0xa0] sm:$0xff]  ;;  %v703_v23 = vld [vmem:[%s3720_s27 + $0xb8] sm:$0xff]  ;;  %v702_v24 = vld [vmem:[%s3720_s27 + $0xb0] sm:$0xff] }
  0x63   : > { %v705_v25 = vld [vmem:[%s3720_s27 + $0xc8] sm:$0xff]  ;;  %v704_v26 = vld [vmem:[%s3720_s27 + $0xc0] sm:$0xff]  ;;  %v707_v27 = vld [vmem:[%s3720_s27 + $0xd8] sm:$0xff] }
  0x64   : > { %963 = vperm.xlu1 %3373, %v685_v5   ;;  %958 = vperm.xlu0 %3372, %v684_v6   ;;  %v706_v28 = vld [vmem:[%s3720_s27 + $0xd0] sm:$0xff]  ;;  %v709_v29 = vld [vmem:[%s3720_s27 + $0xe8] sm:$0xff]  ;;  %v708_v30 = vld [vmem:[%s3720_s27 + $0xe0] sm:$0xff] }
  0x65   : > { %v711_v31 = vld [vmem:[%s3720_s27 + $0xf8] sm:$0xff]  ;;  %v710_v32 = vld [vmem:[%s3720_s27 + $0xf0] sm:$0xff]  ;;  %v713_v33 = vld [vmem:[%s3720_s27 + $0x108] sm:$0xff] }
  0x66   : > { %v712_v34 = vld [vmem:[%s3720_s27 + $0x100] sm:$0xff]  ;;  %v715_v35 = vld [vmem:[%s3720_s27 + $0x118] sm:$0xff]  ;;  %v714_v36 = vld [vmem:[%s3720_s27 + $0x110] sm:$0xff] }
  0x67   : > { %v717_v37 = vld [vmem:[%s3720_s27 + $0x128] sm:$0xff]  ;;  %v716_v38 = vld [vmem:[%s3720_s27 + $0x120] sm:$0xff]  ;;  %v719_v39 = vld [vmem:[%s3720_s27 + $0x138] sm:$0xff] }
  0x68   : > { %973 = vperm.xlu1 %3373, %v687_v7   ;;  %968 = vperm.xlu0 %3372, %v686_v8   ;;  %v718_v40 = vld [vmem:[%s3720_s27 + $0x130] sm:$0xff]  ;;  %v721_v41 = vld [vmem:[%s3720_s27 + $0x148] sm:$0xff]  ;;  %v720_v42 = vld [vmem:[%s3720_s27 + $0x140] sm:$0xff] }
  0x69   : > { %v723_v43 = vld [vmem:[%s3720_s27 + $0x158] sm:$0xff]  ;;  %v722_v44 = vld [vmem:[%s3720_s27 + $0x150] sm:$0xff]  ;;  %v725_v45 = vld [vmem:[%s3720_s27 + $0x168] sm:$0xff] }
  0x6a   : > { %v724_v46 = vld [vmem:[%s3720_s27 + $0x160] sm:$0xff]  ;;  %v727_v47 = vld [vmem:[%s3720_s27 + $0x178] sm:$0xff]  ;;  %v726_v48 = vld [vmem:[%s3720_s27 + $0x170] sm:$0xff] }
  0x6b   : > { %v729_v49 = vld [vmem:[%s3720_s27 + $0x188] sm:$0xff]  ;;  %v728_v50 = vld [vmem:[%s3720_s27 + $0x180] sm:$0xff]  ;;  %v731_v51 = vld [vmem:[%s3720_s27 + $0x198] sm:$0xff] }
  0x6c   : > { %983 = vperm.xlu1 %3373, %v689_v9   ;;  %978 = vperm.xlu0 %3372, %v688_v10   ;;  %v730_v52 = vld [vmem:[%s3720_s27 + $0x190] sm:$0xff]  ;;  %v733_v53 = vld [vmem:[%s3720_s27 + $0x1a8] sm:$0xff]  ;;  %v732_v54 = vld [vmem:[%s3720_s27 + $0x1a0] sm:$0xff] }
  0x6d   : > { %v735_v55 = vld [vmem:[%s3720_s27 + $0x1b8] sm:$0xff]  ;;  %v734_v56 = vld [vmem:[%s3720_s27 + $0x1b0] sm:$0xff]  ;;  %v737_v57 = vld [vmem:[%s3720_s27 + $0x1c8] sm:$0xff] }
  0x6e   : > { %v736_v58 = vld [vmem:[%s3720_s27 + $0x1c0] sm:$0xff]  ;;  %v739_v59 = vld [vmem:[%s3720_s27 + $0x1d8] sm:$0xff]  ;;  %v738_v60 = vld [vmem:[%s3720_s27 + $0x1d0] sm:$0xff] }
  0x6f   : > { %v741_v61 = vld [vmem:[%s3720_s27 + $0x1e8] sm:$0xff]  ;;  %v740_v62 = vld [vmem:[%s3720_s27 + $0x1e0] sm:$0xff]  ;;  %v743_v63 = vld [vmem:[%s3720_s27 + $0x1f8] sm:$0xff] }
  0x70   : > { %993 = vperm.xlu1 %3373, %v691_v11   ;;  %988 = vperm.xlu0 %3372, %v690_v12   ;;  %v742_v0 = vld [vmem:[%s3720_s27 + $0x1f0] sm:$0xff]  ;;  %v3217_v1 = vld [vmem:[%s4769_s1 + $0x2] ss:$0 sm:$0xff]  ;;  %v3215_v2 = vld [vmem:[%s4769_s1] ss:$0 sm:$0xff] }
  0x71   : > { %v745_v3 = vld [vmem:[%s3720_s27 + $0x208] sm:$0xff]  ;;  %v744_v4 = vld [vmem:[%s3720_s27 + $0x200] sm:$0xff]  ;;  %v747_v11 = vld [vmem:[%s3720_s27 + $0x218] sm:$0xff] }
  0x72   : > { %v3218_v9 = vld [vmem:[%s4769_s1 + $0x3] ss:$0 sm:$0xff]  ;;  %v3216_v10 = vld [vmem:[%s4769_s1 + $0x1] ss:$0 sm:$0xff]  ;;  %v746_v12 = vld [vmem:[%s3720_s27 + $0x210] sm:$0xff] }
  0x74   : > { %1003 = vperm.xlu1 %3373, %v693_v13   ;;  %998 = vperm.xlu0 %3372, %v692_v14  }
  0x78   : > { %1013 = vperm.xlu1 %3373, %v695_v15   ;;  %1008 = vperm.xlu0 %3372, %v694_v16  }
  0x7c   : > { %1023 = vperm.xlu1 %3373, %v697_v17   ;;  %1018 = vperm.xlu0 %3372, %v696_v18   ;;  %v3220_v17 = vld [vmem:[%s4769_s1 + $0x5] ss:$0 sm:$0xff]  ;;  %v3219_v18 = vld [vmem:[%s4769_s1 + $0x4] ss:$0 sm:$0xff] }
  0x80   : > { %1033 = vperm.xlu1 %3373, %v699_v19   ;;  %1028 = vperm.xlu0 %3372, %v698_v20   ;;  %v749_v19 = vld [vmem:[%s3720_s27 + $0x228] sm:$0xff]  ;;  %v748_v20 = vld [vmem:[%s3720_s27 + $0x220] sm:$0xff] }
  0x84   : > { %1043 = vperm.xlu1 %3373, %v701_v21   ;;  %1038 = vperm.xlu0 %3372, %v700_v22  }
  0x88   : > { %1053 = vperm.xlu1 %3373, %v703_v23   ;;  %1048 = vperm.xlu0 %3372, %v702_v24  }
  0x8c   : > { %1063 = vperm.xlu1 %3373, %v705_v25   ;;  %1058 = vperm.xlu0 %3372, %v704_v26   ;;  %v3222_v25 = vld [vmem:[%s4769_s1 + $0x7] ss:$0 sm:$0xff]  ;;  %v3221_v26 = vld [vmem:[%s4769_s1 + $0x6] ss:$0 sm:$0xff] }
  0x90   : > { %1073 = vperm.xlu1 %3373, %v707_v27   ;;  %1068 = vperm.xlu0 %3372, %v706_v28   ;;  %v751_v27 = vld [vmem:[%s3720_s27 + $0x238] sm:$0xff]  ;;  %v750_v28 = vld [vmem:[%s3720_s27 + $0x230] sm:$0xff] }
  0x94   : > { %1083 = vperm.xlu1 %3373, %v709_v29   ;;  %1078 = vperm.xlu0 %3372, %v708_v30  }
  0x98   : > { %1093 = vperm.xlu1 %3373, %v711_v31   ;;  %1088 = vperm.xlu0 %3372, %v710_v32  }
  0x9c   : > { %1103 = vperm.xlu1 %3373, %v713_v33   ;;  %1098 = vperm.xlu0 %3372, %v712_v34   ;;  %v3224_v33 = vld [vmem:[%s4769_s1 + $0x9] ss:$0 sm:$0xff]  ;;  %v3223_v34 = vld [vmem:[%s4769_s1 + $0x8] ss:$0 sm:$0xff] }
  0xa0   : > { %1113 = vperm.xlu1 %3373, %v715_v35   ;;  %1108 = vperm.xlu0 %3372, %v714_v36   ;;  %v753_v35 = vld [vmem:[%s3720_s27 + $0x248] sm:$0xff]  ;;  %v752_v36 = vld [vmem:[%s3720_s27 + $0x240] sm:$0xff] }
  0xa4   : > { %1123 = vperm.xlu1 %3373, %v717_v37   ;;  %1118 = vperm.xlu0 %3372, %v716_v38  }
  0xa8   : > { %1133 = vperm.xlu1 %3373, %v719_v39   ;;  %1128 = vperm.xlu0 %3372, %v718_v40  }
  0xac   : > { %1143 = vperm.xlu1 %3373, %v721_v41   ;;  %1138 = vperm.xlu0 %3372, %v720_v42   ;;  %v3226_v41 = vld [vmem:[%s4769_s1 + $0xb] ss:$0 sm:$0xff]  ;;  %v3225_v42 = vld [vmem:[%s4769_s1 + $0xa] ss:$0 sm:$0xff] }
  0xb0   : > { %1153 = vperm.xlu1 %3373, %v723_v43   ;;  %1148 = vperm.xlu0 %3372, %v722_v44   ;;  %v755_v43 = vld [vmem:[%s3720_s27 + $0x258] sm:$0xff]  ;;  %v754_v44 = vld [vmem:[%s3720_s27 + $0x250] sm:$0xff] }
  0xb4   : > { %1163 = vperm.xlu1 %3373, %v725_v45   ;;  %1158 = vperm.xlu0 %3372, %v724_v46  }
  0xb8   : > { %1173 = vperm.xlu1 %3373, %v727_v47   ;;  %1168 = vperm.xlu0 %3372, %v726_v48  }
  0xbc   : > { %1183 = vperm.xlu1 %3373, %v729_v49   ;;  %1178 = vperm.xlu0 %3372, %v728_v50   ;;  %v3228_v49 = vld [vmem:[%s4769_s1 + $0xd] ss:$0 sm:$0xff]  ;;  %v3227_v50 = vld [vmem:[%s4769_s1 + $0xc] ss:$0 sm:$0xff] }
  0xc0   : > { %1193 = vperm.xlu1 %3373, %v731_v51   ;;  %1188 = vperm.xlu0 %3372, %v730_v52   ;;  %v757_v51 = vld [vmem:[%s3720_s27 + $0x268] sm:$0xff]  ;;  %v756_v52 = vld [vmem:[%s3720_s27 + $0x260] sm:$0xff] }
  0xc4   : > { %1203 = vperm.xlu1 %3373, %v733_v53   ;;  %1198 = vperm.xlu0 %3372, %v732_v54  }
  0xc8   : > { %1213 = vperm.xlu1 %3373, %v735_v55   ;;  %1208 = vperm.xlu0 %3372, %v734_v56  }
  0xcc   : > { %1223 = vperm.xlu1 %3373, %v737_v57   ;;  %1218 = vperm.xlu0 %3372, %v736_v58   ;;  %v3230_v57 = vld [vmem:[%s4769_s1 + $0xf] ss:$0 sm:$0xff]  ;;  %v3229_v58 = vld [vmem:[%s4769_s1 + $0xe] ss:$0 sm:$0xff] }
  0xd0   : > { %1233 = vperm.xlu1 %3373, %v739_v59   ;;  %1228 = vperm.xlu0 %3372, %v738_v60   ;;  %v759_v59 = vld [vmem:[%s3720_s27 + $0x278] sm:$0xff]  ;;  %v758_v60 = vld [vmem:[%s3720_s27 + $0x270] sm:$0xff] }
  0xd4   : > { %1243 = vperm.xlu1 %3373, %v741_v61   ;;  %1238 = vperm.xlu0 %3372, %v740_v62  }
  0xd8   : > { %1253 = vperm.xlu1 %3373, %v743_v63   ;;  %1248 = vperm.xlu0 %3372, %v742_v0  }
  0xdb   : > { %v949_v5 = vpop.permute.xlu1 %948  ;;  %v939_v6 = vpop.permute.xlu0 %938 }
  0xdc   : > { %v2346_v7 = vadd.f32 %v3217_v1, %v949_v5  ;;  %v2344_v8 = vadd.f32 %v3215_v2, %v939_v6  ;;  %1263 = vperm.xlu1 %3373, %v745_v3   ;;  %1258 = vperm.xlu0 %3372, %v744_v4   ;;  %v3232_v1 = vld [vmem:[%s4769_s1 + $0x11] ss:$0 sm:$0xff]  ;;  %v3231_v2 = vld [vmem:[%s4769_s1 + $0x10] ss:$0 sm:$0xff]  ;;  %v761_v3 = vld [vmem:[%s3720_s27 + $0x288] sm:$0xff] }
  0xdd   : > { %v760_v4 = vld [vmem:[%s3720_s27 + $0x280] sm:$0xff] }
  0xde   : > { %2475 = vst.msk [vmem:[%s3803_s8 + $0x10] sm:$0xff] %vm2472_vm0, %v2346_v7  ;;  %2473 = vst.msk [vmem:[%s3803_s8] sm:$0xff] %vm2472_vm0, %v2344_v8 }
  0xdf   : > { %v954_v13 = vpop.permute.xlu1 %953  ;;  %v944_v14 = vpop.permute.xlu0 %943 }
  0xe0   : > { %v2347_v15 = vadd.f32 %v3218_v9, %v954_v13  ;;  %v2345_v16 = vadd.f32 %v3216_v10, %v944_v14  ;;  %1273 = vperm.xlu1 %3373, %v747_v11   ;;  %1268 = vperm.xlu0 %3372, %v746_v12   ;;  %v3234_v9 = vld [vmem:[%s4769_s1 + $0x13] ss:$0 sm:$0xff]  ;;  %v3233_v10 = vld [vmem:[%s4769_s1 + $0x12] ss:$0 sm:$0xff]  ;;  %v763_v11 = vld [vmem:[%s3720_s27 + $0x298] sm:$0xff] }
  0xe1   : > { %v762_v12 = vld [vmem:[%s3720_s27 + $0x290] sm:$0xff] }
  0xe2   : > { %2476 = vst.msk [vmem:[%s3803_s8 + $0x18] sm:$0xff] %vm2472_vm0, %v2347_v15  ;;  %2474 = vst.msk [vmem:[%s3803_s8 + $0x8] sm:$0xff] %vm2472_vm0, %v2345_v16 }
  0xe3   : > { %v964_v21 = vpop.permute.xlu1 %963  ;;  %v959_v22 = vpop.permute.xlu0 %958 }
  0xe4   : > { %v2349_v23 = vadd.f32 %v3220_v17, %v964_v21  ;;  %v2348_v24 = vadd.f32 %v3219_v18, %v959_v22  ;;  %1283 = vperm.xlu1 %3373, %v749_v19   ;;  %1278 = vperm.xlu0 %3372, %v748_v20   ;;  %v3236_v17 = vld [vmem:[%s4769_s1 + $0x15] ss:$0 sm:$0xff]  ;;  %v3235_v18 = vld [vmem:[%s4769_s1 + $0x14] ss:$0 sm:$0xff]  ;;  %v765_v19 = vld [vmem:[%s3720_s27 + $0x2a8] sm:$0xff] }
  0xe5   : > { %v764_v20 = vld [vmem:[%s3720_s27 + $0x2a0] sm:$0xff] }
  0xe6   : > { %2478 = vst.msk [vmem:[%s3803_s8 + $0x28] sm:$0xff] %vm2472_vm0, %v2349_v23  ;;  %2477 = vst.msk [vmem:[%s3803_s8 + $0x20] sm:$0xff] %vm2472_vm0, %v2348_v24 }
  0xe7   : > { %v974_v29 = vpop.permute.xlu1 %973  ;;  %v969_v30 = vpop.permute.xlu0 %968 }
  0xe8   : > { %v2351_v31 = vadd.f32 %v3222_v25, %v974_v29  ;;  %v2350_v32 = vadd.f32 %v3221_v26, %v969_v30  ;;  %1293 = vperm.xlu1 %3373, %v751_v27   ;;  %1288 = vperm.xlu0 %3372, %v750_v28   ;;  %v3238_v25 = vld [vmem:[%s4769_s1 + $0x17] ss:$0 sm:$0xff]  ;;  %v3237_v26 = vld [vmem:[%s4769_s1 + $0x16] ss:$0 sm:$0xff]  ;;  %v767_v27 = vld [vmem:[%s3720_s27 + $0x2b8] sm:$0xff] }
  0xe9   : > { %v766_v28 = vld [vmem:[%s3720_s27 + $0x2b0] sm:$0xff] }
  0xea   : > { %2480 = vst.msk [vmem:[%s3803_s8 + $0x38] sm:$0xff] %vm2472_vm0, %v2351_v31  ;;  %2479 = vst.msk [vmem:[%s3803_s8 + $0x30] sm:$0xff] %vm2472_vm0, %v2350_v32 }
  0xeb   : > { %v984_v37 = vpop.permute.xlu1 %983  ;;  %v979_v38 = vpop.permute.xlu0 %978 }
  0xec   : > { %v2353_v39 = vadd.f32 %v3224_v33, %v984_v37  ;;  %v2352_v40 = vadd.f32 %v3223_v34, %v979_v38  ;;  %1303 = vperm.xlu1 %3373, %v753_v35   ;;  %1298 = vperm.xlu0 %3372, %v752_v36   ;;  %v3240_v33 = vld [vmem:[%s4769_s1 + $0x19] ss:$0 sm:$0xff]  ;;  %v3239_v34 = vld [vmem:[%s4769_s1 + $0x18] ss:$0 sm:$0xff]  ;;  %v769_v35 = vld [vmem:[%s3720_s27 + $0x2c8] sm:$0xff] }
  0xed   : > { %v768_v36 = vld [vmem:[%s3720_s27 + $0x2c0] sm:$0xff] }
  0xee   : > { %2482 = vst.msk [vmem:[%s3803_s8 + $0x48] sm:$0xff] %vm2472_vm0, %v2353_v39  ;;  %2481 = vst.msk [vmem:[%s3803_s8 + $0x40] sm:$0xff] %vm2472_vm0, %v2352_v40 }
  0xef   : > { %v994_v45 = vpop.permute.xlu1 %993  ;;  %v989_v46 = vpop.permute.xlu0 %988 }
  0xf0   : > { %v2355_v47 = vadd.f32 %v3226_v41, %v994_v45  ;;  %v2354_v48 = vadd.f32 %v3225_v42, %v989_v46  ;;  %1313 = vperm.xlu1 %3373, %v755_v43   ;;  %1308 = vperm.xlu0 %3372, %v754_v44   ;;  %v3242_v41 = vld [vmem:[%s4769_s1 + $0x1b] ss:$0 sm:$0xff]  ;;  %v3241_v42 = vld [vmem:[%s4769_s1 + $0x1a] ss:$0 sm:$0xff]  ;;  %v770_v44 = vld [vmem:[%s3720_s27 + $0x2d0] sm:$0xff] }
  0xf1   : > { %v771_v43 = vld [vmem:[%s3720_s27 + $0x2d8] sm:$0xff] }
  0xf2   : > { %2484 = vst.msk [vmem:[%s3803_s8 + $0x58] sm:$0xff] %vm2472_vm0, %v2355_v47  ;;  %2483 = vst.msk [vmem:[%s3803_s8 + $0x50] sm:$0xff] %vm2472_vm0, %v2354_v48 }
  0xf3   : > { %v1004_v53 = vpop.permute.xlu1 %1003  ;;  %v999_v54 = vpop.permute.xlu0 %998 }
  0xf4   : > { %v2357_v55 = vadd.f32 %v3228_v49, %v1004_v53  ;;  %v2356_v56 = vadd.f32 %v3227_v50, %v999_v54  ;;  %1323 = vperm.xlu1 %3373, %v757_v51   ;;  %1318 = vperm.xlu0 %3372, %v756_v52   ;;  %v3244_v49 = vld [vmem:[%s4769_s1 + $0x1d] ss:$0 sm:$0xff]  ;;  %v3243_v50 = vld [vmem:[%s4769_s1 + $0x1c] ss:$0 sm:$0xff]  ;;  %v773_v51 = vld [vmem:[%s3720_s27 + $0x2e8] sm:$0xff] }
  0xf5   : > { %v772_v52 = vld [vmem:[%s3720_s27 + $0x2e0] sm:$0xff] }
  0xf6   : > { %2486 = vst.msk [vmem:[%s3803_s8 + $0x68] sm:$0xff] %vm2472_vm0, %v2357_v55  ;;  %2485 = vst.msk [vmem:[%s3803_s8 + $0x60] sm:$0xff] %vm2472_vm0, %v2356_v56 }
  0xf7   : > { %v1014_v61 = vpop.permute.xlu1 %1013  ;;  %v1009_v62 = vpop.permute.xlu0 %1008 }
  0xf8   : > { %v2359_v63 = vadd.f32 %v3230_v57, %v1014_v61  ;;  %v2358_v0 = vadd.f32 %v3229_v58, %v1009_v62  ;;  %1333 = vperm.xlu1 %3373, %v759_v59   ;;  %1328 = vperm.xlu0 %3372, %v758_v60   ;;  %v3246_v57 = vld [vmem:[%s4769_s1 + $0x1f] ss:$0 sm:$0xff]  ;;  %v3245_v58 = vld [vmem:[%s4769_s1 + $0x1e] ss:$0 sm:$0xff]  ;;  %v774_v60 = vld [vmem:[%s3720_s27 + $0x2f0] sm:$0xff] }
  0xf9   : > { %v775_v59 = vld [vmem:[%s3720_s27 + $0x2f8] sm:$0xff] }
  0xfa   : > { %2488 = vst.msk [vmem:[%s3803_s8 + $0x78] sm:$0xff] %vm2472_vm0, %v2359_v63  ;;  %2487 = vst.msk [vmem:[%s3803_s8 + $0x70] sm:$0xff] %vm2472_vm0, %v2358_v0 }
  0xfb   : > { %v1024_v5 = vpop.permute.xlu1 %1023  ;;  %v1019_v6 = vpop.permute.xlu0 %1018 }
  0xfc   : > { %v2361_v7 = vadd.f32 %v3232_v1, %v1024_v5  ;;  %v2360_v8 = vadd.f32 %v3231_v2, %v1019_v6  ;;  %1343 = vperm.xlu1 %3373, %v761_v3   ;;  %1338 = vperm.xlu0 %3372, %v760_v4   ;;  %v3248_v1 = vld [vmem:[%s4769_s1 + $0x21] ss:$0 sm:$0xff]  ;;  %v3247_v2 = vld [vmem:[%s4769_s1 + $0x20] ss:$0 sm:$0xff]  ;;  %v777_v3 = vld [vmem:[%s3720_s27 + $0x308] sm:$0xff] }
  0xfd   : > { %v776_v4 = vld [vmem:[%s3720_s27 + $0x300] sm:$0xff] }
  0xfe   : > { %2490 = vst.msk [vmem:[%s3803_s8 + $0x88] sm:$0xff] %vm2472_vm0, %v2361_v7  ;;  %2489 = vst.msk [vmem:[%s3803_s8 + $0x80] sm:$0xff] %vm2472_vm0, %v2360_v8 }
  0xff   : > { %v1034_v13 = vpop.permute.xlu1 %1033  ;;  %v1029_v14 = vpop.permute.xlu0 %1028 }
 0x100   : > { %v2363_v15 = vadd.f32 %v3234_v9, %v1034_v13  ;;  %v2362_v16 = vadd.f32 %v3233_v10, %v1029_v14  ;;  %1353 = vperm.xlu1 %3373, %v763_v11   ;;  %1348 = vperm.xlu0 %3372, %v762_v12   ;;  %v3250_v9 = vld [vmem:[%s4769_s1 + $0x23] ss:$0 sm:$0xff]  ;;  %v3249_v10 = vld [vmem:[%s4769_s1 + $0x22] ss:$0 sm:$0xff]  ;;  %v779_v11 = vld [vmem:[%s3720_s27 + $0x318] sm:$0xff] }
 0x101   : > { %v778_v12 = vld [vmem:[%s3720_s27 + $0x310] sm:$0xff] }
 0x102   : > { %2492 = vst.msk [vmem:[%s3803_s8 + $0x98] sm:$0xff] %vm2472_vm0, %v2363_v15  ;;  %2491 = vst.msk [vmem:[%s3803_s8 + $0x90] sm:$0xff] %vm2472_vm0, %v2362_v16 }
 0x103   : > { %v1044_v21 = vpop.permute.xlu1 %1043  ;;  %v1039_v22 = vpop.permute.xlu0 %1038 }
 0x104   : > { %v2365_v23 = vadd.f32 %v3236_v17, %v1044_v21  ;;  %v2364_v24 = vadd.f32 %v3235_v18, %v1039_v22  ;;  %1363 = vperm.xlu1 %3373, %v765_v19   ;;  %1358 = vperm.xlu0 %3372, %v764_v20   ;;  %v3252_v17 = vld [vmem:[%s4769_s1 + $0x25] ss:$0 sm:$0xff]  ;;  %v3251_v18 = vld [vmem:[%s4769_s1 + $0x24] ss:$0 sm:$0xff]  ;;  %v781_v19 = vld [vmem:[%s3720_s27 + $0x328] sm:$0xff] }
 0x105   : > { %v780_v20 = vld [vmem:[%s3720_s27 + $0x320] sm:$0xff] }
 0x106   : > { %2494 = vst.msk [vmem:[%s3803_s8 + $0xa8] sm:$0xff] %vm2472_vm0, %v2365_v23  ;;  %2493 = vst.msk [vmem:[%s3803_s8 + $0xa0] sm:$0xff] %vm2472_vm0, %v2364_v24 }
 0x107   : > { %v1054_v29 = vpop.permute.xlu1 %1053  ;;  %v1049_v30 = vpop.permute.xlu0 %1048 }
 0x108   : > { %v2367_v31 = vadd.f32 %v3238_v25, %v1054_v29  ;;  %v2366_v32 = vadd.f32 %v3237_v26, %v1049_v30  ;;  %1373 = vperm.xlu1 %3373, %v767_v27   ;;  %1368 = vperm.xlu0 %3372, %v766_v28   ;;  %v3254_v25 = vld [vmem:[%s4769_s1 + $0x27] ss:$0 sm:$0xff]  ;;  %v3253_v26 = vld [vmem:[%s4769_s1 + $0x26] ss:$0 sm:$0xff]  ;;  %v783_v27 = vld [vmem:[%s3720_s27 + $0x338] sm:$0xff] }
 0x109   : > { %v782_v28 = vld [vmem:[%s3720_s27 + $0x330] sm:$0xff] }
 0x10a   : > { %2496 = vst.msk [vmem:[%s3803_s8 + $0xb8] sm:$0xff] %vm2472_vm0, %v2367_v31  ;;  %2495 = vst.msk [vmem:[%s3803_s8 + $0xb0] sm:$0xff] %vm2472_vm0, %v2366_v32 }
 0x10b   : > { %v1064_v37 = vpop.permute.xlu1 %1063  ;;  %v1059_v38 = vpop.permute.xlu0 %1058 }
 0x10c   : > { %v2369_v39 = vadd.f32 %v3240_v33, %v1064_v37  ;;  %v2368_v40 = vadd.f32 %v3239_v34, %v1059_v38  ;;  %1383 = vperm.xlu1 %3373, %v769_v35   ;;  %1378 = vperm.xlu0 %3372, %v768_v36   ;;  %v3256_v33 = vld [vmem:[%s4769_s1 + $0x29] ss:$0 sm:$0xff]  ;;  %v3255_v34 = vld [vmem:[%s4769_s1 + $0x28] ss:$0 sm:$0xff]  ;;  %v784_v36 = vld [vmem:[%s3720_s27 + $0x340] sm:$0xff] }
 0x10d   : > { %v785_v35 = vld [vmem:[%s3720_s27 + $0x348] sm:$0xff] }
 0x10e   : > { %2498 = vst.msk [vmem:[%s3803_s8 + $0xc8] sm:$0xff] %vm2472_vm0, %v2369_v39  ;;  %2497 = vst.msk [vmem:[%s3803_s8 + $0xc0] sm:$0xff] %vm2472_vm0, %v2368_v40 }
 0x10f   : > { %v1074_v45 = vpop.permute.xlu1 %1073  ;;  %v1069_v46 = vpop.permute.xlu0 %1068 }
 0x110   : > { %v2371_v47 = vadd.f32 %v3242_v41, %v1074_v45  ;;  %v2370_v48 = vadd.f32 %v3241_v42, %v1069_v46  ;;  %1393 = vperm.xlu1 %3373, %v771_v43   ;;  %1388 = vperm.xlu0 %3372, %v770_v44   ;;  %v3258_v41 = vld [vmem:[%s4769_s1 + $0x2b] ss:$0 sm:$0xff]  ;;  %v3257_v42 = vld [vmem:[%s4769_s1 + $0x2a] ss:$0 sm:$0xff]  ;;  %v787_v43 = vld [vmem:[%s3720_s27 + $0x358] sm:$0xff] }
 0x111   : > { %v786_v44 = vld [vmem:[%s3720_s27 + $0x350] sm:$0xff] }
 0x112   : > { %2500 = vst.msk [vmem:[%s3803_s8 + $0xd8] sm:$0xff] %vm2472_vm0, %v2371_v47  ;;  %2499 = vst.msk [vmem:[%s3803_s8 + $0xd0] sm:$0xff] %vm2472_vm0, %v2370_v48 }
 0x113   : > { %v1084_v53 = vpop.permute.xlu1 %1083  ;;  %v1079_v54 = vpop.permute.xlu0 %1078 }
 0x114   : > { %v2373_v55 = vadd.f32 %v3244_v49, %v1084_v53  ;;  %v2372_v56 = vadd.f32 %v3243_v50, %v1079_v54  ;;  %1403 = vperm.xlu1 %3373, %v773_v51   ;;  %1398 = vperm.xlu0 %3372, %v772_v52   ;;  %v3260_v49 = vld [vmem:[%s4769_s1 + $0x2d] ss:$0 sm:$0xff]  ;;  %v3259_v50 = vld [vmem:[%s4769_s1 + $0x2c] ss:$0 sm:$0xff]  ;;  %v788_v52 = vld [vmem:[%s3720_s27 + $0x360] sm:$0xff] }
 0x115   : > { %v789_v51 = vld [vmem:[%s3720_s27 + $0x368] sm:$0xff] }
 0x116   : > { %2502 = vst.msk [vmem:[%s3803_s8 + $0xe8] sm:$0xff] %vm2472_vm0, %v2373_v55  ;;  %2501 = vst.msk [vmem:[%s3803_s8 + $0xe0] sm:$0xff] %vm2472_vm0, %v2372_v56 }
 0x117   : > { %v1094_v61 = vpop.permute.xlu1 %1093  ;;  %v1089_v62 = vpop.permute.xlu0 %1088 }
 0x118   : > { %v2375_v63 = vadd.f32 %v3246_v57, %v1094_v61  ;;  %v2374_v0 = vadd.f32 %v3245_v58, %v1089_v62  ;;  %1413 = vperm.xlu1 %3373, %v775_v59   ;;  %1408 = vperm.xlu0 %3372, %v774_v60   ;;  %v3262_v57 = vld [vmem:[%s4769_s1 + $0x2f] ss:$0 sm:$0xff]  ;;  %v3261_v58 = vld [vmem:[%s4769_s1 + $0x2e] ss:$0 sm:$0xff]  ;;  %v791_v59 = vld [vmem:[%s3720_s27 + $0x378] sm:$0xff] }
 0x119   : > { %v790_v60 = vld [vmem:[%s3720_s27 + $0x370] sm:$0xff] }
 0x11a   : > { %2504 = vst.msk [vmem:[%s3803_s8 + $0xf8] sm:$0xff] %vm2472_vm0, %v2375_v63  ;;  %2503 = vst.msk [vmem:[%s3803_s8 + $0xf0] sm:$0xff] %vm2472_vm0, %v2374_v0 }
 0x11b   : > { %v1104_v5 = vpop.permute.xlu1 %1103  ;;  %v1099_v6 = vpop.permute.xlu0 %1098 }
 0x11c   : > { %v2377_v7 = vadd.f32 %v3248_v1, %v1104_v5  ;;  %v2376_v8 = vadd.f32 %v3247_v2, %v1099_v6  ;;  %1423 = vperm.xlu1 %3373, %v777_v3   ;;  %1418 = vperm.xlu0 %3372, %v776_v4   ;;  %v3264_v1 = vld [vmem:[%s4769_s1 + $0x31] ss:$0 sm:$0xff]  ;;  %v3263_v2 = vld [vmem:[%s4769_s1 + $0x30] ss:$0 sm:$0xff]  ;;  %v793_v3 = vld [vmem:[%s3720_s27 + $0x388] sm:$0xff] }
 0x11d   : > { %v792_v4 = vld [vmem:[%s3720_s27 + $0x380] sm:$0xff] }
 0x11e   : > { %2506 = vst.msk [vmem:[%s3803_s8 + $0x108] sm:$0xff] %vm2472_vm0, %v2377_v7  ;;  %2505 = vst.msk [vmem:[%s3803_s8 + $0x100] sm:$0xff] %vm2472_vm0, %v2376_v8 }
 0x11f   : > { %v1114_v13 = vpop.permute.xlu1 %1113  ;;  %v1109_v14 = vpop.permute.xlu0 %1108 }
 0x120   : > { %v2379_v15 = vadd.f32 %v3250_v9, %v1114_v13  ;;  %v2378_v16 = vadd.f32 %v3249_v10, %v1109_v14  ;;  %1433 = vperm.xlu1 %3373, %v779_v11   ;;  %1428 = vperm.xlu0 %3372, %v778_v12   ;;  %v3266_v9 = vld [vmem:[%s4769_s1 + $0x33] ss:$0 sm:$0xff]  ;;  %v3265_v10 = vld [vmem:[%s4769_s1 + $0x32] ss:$0 sm:$0xff]  ;;  %v795_v11 = vld [vmem:[%s3720_s27 + $0x398] sm:$0xff] }
 0x121   : > { %v794_v12 = vld [vmem:[%s3720_s27 + $0x390] sm:$0xff] }
 0x122   : > { %2508 = vst.msk [vmem:[%s3803_s8 + $0x118] sm:$0xff] %vm2472_vm0, %v2379_v15  ;;  %2507 = vst.msk [vmem:[%s3803_s8 + $0x110] sm:$0xff] %vm2472_vm0, %v2378_v16 }
 0x123   : > { %v1124_v21 = vpop.permute.xlu1 %1123  ;;  %v1119_v22 = vpop.permute.xlu0 %1118 }
 0x124   : > { %v2381_v23 = vadd.f32 %v3252_v17, %v1124_v21  ;;  %v2380_v24 = vadd.f32 %v3251_v18, %v1119_v22  ;;  %1443 = vperm.xlu1 %3373, %v781_v19   ;;  %1438 = vperm.xlu0 %3372, %v780_v20   ;;  %v3268_v17 = vld [vmem:[%s4769_s1 + $0x35] ss:$0 sm:$0xff]  ;;  %v3267_v18 = vld [vmem:[%s4769_s1 + $0x34] ss:$0 sm:$0xff]  ;;  %v797_v19 = vld [vmem:[%s3720_s27 + $0x3a8] sm:$0xff] }
 0x125   : > { %v796_v20 = vld [vmem:[%s3720_s27 + $0x3a0] sm:$0xff] }
 0x126   : > { %2510 = vst.msk [vmem:[%s3803_s8 + $0x128] sm:$0xff] %vm2472_vm0, %v2381_v23  ;;  %2509 = vst.msk [vmem:[%s3803_s8 + $0x120] sm:$0xff] %vm2472_vm0, %v2380_v24 }
 0x127   : > { %v1134_v29 = vpop.permute.xlu1 %1133  ;;  %v1129_v30 = vpop.permute.xlu0 %1128 }
 0x128   : > { %v2383_v31 = vadd.f32 %v3254_v25, %v1134_v29  ;;  %v2382_v32 = vadd.f32 %v3253_v26, %v1129_v30  ;;  %1453 = vperm.xlu1 %3373, %v783_v27   ;;  %1448 = vperm.xlu0 %3372, %v782_v28   ;;  %v3270_v25 = vld [vmem:[%s4769_s1 + $0x37] ss:$0 sm:$0xff]  ;;  %v3269_v26 = vld [vmem:[%s4769_s1 + $0x36] ss:$0 sm:$0xff]  ;;  %v799_v27 = vld [vmem:[%s3720_s27 + $0x3b8] sm:$0xff] }
 0x129   : > { %v798_v28 = vld [vmem:[%s3720_s27 + $0x3b0] sm:$0xff] }
 0x12a   : > { %2512 = vst.msk [vmem:[%s3803_s8 + $0x138] sm:$0xff] %vm2472_vm0, %v2383_v31  ;;  %2511 = vst.msk [vmem:[%s3803_s8 + $0x130] sm:$0xff] %vm2472_vm0, %v2382_v32 }
 0x12b   : > { %v1144_v37 = vpop.permute.xlu1 %1143  ;;  %v1139_v38 = vpop.permute.xlu0 %1138 }
 0x12c   : > { %v2385_v39 = vadd.f32 %v3256_v33, %v1144_v37  ;;  %v2384_v40 = vadd.f32 %v3255_v34, %v1139_v38  ;;  %1463 = vperm.xlu1 %3373, %v785_v35   ;;  %1458 = vperm.xlu0 %3372, %v784_v36   ;;  %v3272_v33 = vld [vmem:[%s4769_s1 + $0x39] ss:$0 sm:$0xff]  ;;  %v3271_v34 = vld [vmem:[%s4769_s1 + $0x38] ss:$0 sm:$0xff]  ;;  %v801_v35 = vld [vmem:[%s3720_s27 + $0x3c8] sm:$0xff] }
 0x12d   : > { %v800_v36 = vld [vmem:[%s3720_s27 + $0x3c0] sm:$0xff] }
 0x12e   : > { %2514 = vst.msk [vmem:[%s3803_s8 + $0x148] sm:$0xff] %vm2472_vm0, %v2385_v39  ;;  %2513 = vst.msk [vmem:[%s3803_s8 + $0x140] sm:$0xff] %vm2472_vm0, %v2384_v40 }
 0x12f   : > { %v1154_v45 = vpop.permute.xlu1 %1153  ;;  %v1149_v46 = vpop.permute.xlu0 %1148 }
 0x130   : > { %v2387_v47 = vadd.f32 %v3258_v41, %v1154_v45  ;;  %v2386_v48 = vadd.f32 %v3257_v42, %v1149_v46  ;;  %1473 = vperm.xlu1 %3373, %v787_v43   ;;  %1468 = vperm.xlu0 %3372, %v786_v44   ;;  %v3274_v41 = vld [vmem:[%s4769_s1 + $0x3b] ss:$0 sm:$0xff]  ;;  %v3273_v42 = vld [vmem:[%s4769_s1 + $0x3a] ss:$0 sm:$0xff]  ;;  %v802_v44 = vld [vmem:[%s3720_s27 + $0x3d0] sm:$0xff] }
 0x131   : > { %v803_v43 = vld [vmem:[%s3720_s27 + $0x3d8] sm:$0xff] }
 0x132   : > { %2516 = vst.msk [vmem:[%s3803_s8 + $0x158] sm:$0xff] %vm2472_vm0, %v2387_v47  ;;  %2515 = vst.msk [vmem:[%s3803_s8 + $0x150] sm:$0xff] %vm2472_vm0, %v2386_v48 }
 0x133   : > { %v1164_v53 = vpop.permute.xlu1 %1163  ;;  %v1159_v54 = vpop.permute.xlu0 %1158 }
 0x134   : > { %v2389_v55 = vadd.f32 %v3260_v49, %v1164_v53  ;;  %v2388_v56 = vadd.f32 %v3259_v50, %v1159_v54  ;;  %1483 = vperm.xlu1 %3373, %v789_v51   ;;  %1478 = vperm.xlu0 %3372, %v788_v52   ;;  %v3276_v49 = vld [vmem:[%s4769_s1 + $0x3d] ss:$0 sm:$0xff]  ;;  %v3275_v50 = vld [vmem:[%s4769_s1 + $0x3c] ss:$0 sm:$0xff]  ;;  %v805_v51 = vld [vmem:[%s3720_s27 + $0x3e8] sm:$0xff] }
 0x135   : > { %v804_v52 = vld [vmem:[%s3720_s27 + $0x3e0] sm:$0xff] }
 0x136   : > { %2518 = vst.msk [vmem:[%s3803_s8 + $0x168] sm:$0xff] %vm2472_vm0, %v2389_v55  ;;  %2517 = vst.msk [vmem:[%s3803_s8 + $0x160] sm:$0xff] %vm2472_vm0, %v2388_v56 }
 0x137   : > { %v1174_v61 = vpop.permute.xlu1 %1173  ;;  %v1169_v62 = vpop.permute.xlu0 %1168 }
 0x138   : > { %v2391_v63 = vadd.f32 %v3262_v57, %v1174_v61  ;;  %v2390_v0 = vadd.f32 %v3261_v58, %v1169_v62  ;;  %1493 = vperm.xlu1 %3373, %v791_v59   ;;  %1488 = vperm.xlu0 %3372, %v790_v60   ;;  %v3278_v57 = vld [vmem:[%s4769_s1 + $0x3f] ss:$0 sm:$0xff]  ;;  %v3277_v58 = vld [vmem:[%s4769_s1 + $0x3e] ss:$0 sm:$0xff]  ;;  %v806_v60 = vld [vmem:[%s3720_s27 + $0x3f0] sm:$0xff] }
 0x139   : > { %v807_v59 = vld [vmem:[%s3720_s27 + $0x3f8] sm:$0xff] }
 0x13a   : > { %2520 = vst.msk [vmem:[%s3803_s8 + $0x178] sm:$0xff] %vm2472_vm0, %v2391_v63  ;;  %2519 = vst.msk [vmem:[%s3803_s8 + $0x170] sm:$0xff] %vm2472_vm0, %v2390_v0 }
 0x13b   : > { %v1184_v5 = vpop.permute.xlu1 %1183  ;;  %v1179_v6 = vpop.permute.xlu0 %1178 }
 0x13c   : > { %v2393_v7 = vadd.f32 %v3264_v1, %v1184_v5  ;;  %v2392_v8 = vadd.f32 %v3263_v2, %v1179_v6  ;;  %1503 = vperm.xlu1 %3373, %v793_v3   ;;  %1498 = vperm.xlu0 %3372, %v792_v4   ;;  %v3280_v1 = vld [vmem:[%s4769_s1 + $0x41] ss:$0 sm:$0xff]  ;;  %v3279_v2 = vld [vmem:[%s4769_s1 + $0x40] ss:$0 sm:$0xff] }
 0x13e   : > { %2522 = vst.msk [vmem:[%s3803_s8 + $0x188] sm:$0xff] %vm2472_vm0, %v2393_v7  ;;  %2521 = vst.msk [vmem:[%s3803_s8 + $0x180] sm:$0xff] %vm2472_vm0, %v2392_v8  ;;  %v3282_v7 = vld [vmem:[%s4769_s1 + $0x43] ss:$0 sm:$0xff]  ;;  %v3281_v8 = vld [vmem:[%s4769_s1 + $0x42] ss:$0 sm:$0xff] }
 0x13f   : > { %v1194_v13 = vpop.permute.xlu1 %1193  ;;  %v1189_v14 = vpop.permute.xlu0 %1188 }
 0x140   : > { %v2395_v15 = vadd.f32 %v3266_v9, %v1194_v13  ;;  %v2394_v16 = vadd.f32 %v3265_v10, %v1189_v14  ;;  %1513 = vperm.xlu1 %3373, %v795_v11   ;;  %1508 = vperm.xlu0 %3372, %v794_v12   ;;  %v3284_v13 = vld [vmem:[%s4769_s1 + $0x45] ss:$0 sm:$0xff]  ;;  %v3283_v14 = vld [vmem:[%s4769_s1 + $0x44] ss:$0 sm:$0xff] }
 0x142   : > { %2524 = vst.msk [vmem:[%s3803_s8 + $0x198] sm:$0xff] %vm2472_vm0, %v2395_v15  ;;  %2523 = vst.msk [vmem:[%s3803_s8 + $0x190] sm:$0xff] %vm2472_vm0, %v2394_v16 }
 0x143   : > { %v1204_v21 = vpop.permute.xlu1 %1203  ;;  %v1199_v22 = vpop.permute.xlu0 %1198 }
 0x144   : > { %v2397_v23 = vadd.f32 %v3268_v17, %v1204_v21  ;;  %v2396_v24 = vadd.f32 %v3267_v18, %v1199_v22  ;;  %1523 = vperm.xlu1 %3373, %v797_v19   ;;  %1518 = vperm.xlu0 %3372, %v796_v20   ;;  %v3286_v19 = vld [vmem:[%s4769_s1 + $0x47] ss:$0 sm:$0xff]  ;;  %v3285_v20 = vld [vmem:[%s4769_s1 + $0x46] ss:$0 sm:$0xff] }
 0x146   : > { %2526 = vst.msk [vmem:[%s3803_s8 + $0x1a8] sm:$0xff] %vm2472_vm0, %v2397_v23  ;;  %2525 = vst.msk [vmem:[%s3803_s8 + $0x1a0] sm:$0xff] %vm2472_vm0, %v2396_v24 }
 0x147   : > { %v1214_v29 = vpop.permute.xlu1 %1213  ;;  %v1209_v30 = vpop.permute.xlu0 %1208 }
 0x148   : > { %v2399_v31 = vadd.f32 %v3270_v25, %v1214_v29  ;;  %v2398_v32 = vadd.f32 %v3269_v26, %v1209_v30  ;;  %1533 = vperm.xlu1 %3373, %v799_v27   ;;  %1528 = vperm.xlu0 %3372, %v798_v28   ;;  %v3288_v25 = vld [vmem:[%s4769_s1 + $0x49] ss:$0 sm:$0xff]  ;;  %v3287_v26 = vld [vmem:[%s4769_s1 + $0x48] ss:$0 sm:$0xff] }
 0x14a   : > { %2528 = vst.msk [vmem:[%s3803_s8 + $0x1b8] sm:$0xff] %vm2472_vm0, %v2399_v31  ;;  %2527 = vst.msk [vmem:[%s3803_s8 + $0x1b0] sm:$0xff] %vm2472_vm0, %v2398_v32  ;;  %v3290_v31 = vld [vmem:[%s4769_s1 + $0x4b] ss:$0 sm:$0xff]  ;;  %v3289_v32 = vld [vmem:[%s4769_s1 + $0x4a] ss:$0 sm:$0xff] }
 0x14b   : > { %v1224_v37 = vpop.permute.xlu1 %1223  ;;  %v1219_v38 = vpop.permute.xlu0 %1218 }
 0x14c   : > { %v2401_v39 = vadd.f32 %v3272_v33, %v1224_v37  ;;  %v2400_v40 = vadd.f32 %v3271_v34, %v1219_v38  ;;  %1543 = vperm.xlu1 %3373, %v801_v35   ;;  %1538 = vperm.xlu0 %3372, %v800_v36   ;;  %v3292_v37 = vld [vmem:[%s4769_s1 + $0x4d] ss:$0 sm:$0xff]  ;;  %v3291_v38 = vld [vmem:[%s4769_s1 + $0x4c] ss:$0 sm:$0xff] }
 0x14e   : > { %2530 = vst.msk [vmem:[%s3803_s8 + $0x1c8] sm:$0xff] %vm2472_vm0, %v2401_v39  ;;  %2529 = vst.msk [vmem:[%s3803_s8 + $0x1c0] sm:$0xff] %vm2472_vm0, %v2400_v40 }
 0x14f   : > { %v1234_v45 = vpop.permute.xlu1 %1233  ;;  %v1229_v46 = vpop.permute.xlu0 %1228 }
 0x150   : > { %v2403_v47 = vadd.f32 %v3274_v41, %v1234_v45  ;;  %v2402_v48 = vadd.f32 %v3273_v42, %v1229_v46  ;;  %1553 = vperm.xlu1 %3373, %v803_v43   ;;  %1548 = vperm.xlu0 %3372, %v802_v44   ;;  %v3294_v43 = vld [vmem:[%s4769_s1 + $0x4f] ss:$0 sm:$0xff]  ;;  %v3293_v44 = vld [vmem:[%s4769_s1 + $0x4e] ss:$0 sm:$0xff] }
 0x152   : > { %2532 = vst.msk [vmem:[%s3803_s8 + $0x1d8] sm:$0xff] %vm2472_vm0, %v2403_v47  ;;  %2531 = vst.msk [vmem:[%s3803_s8 + $0x1d0] sm:$0xff] %vm2472_vm0, %v2402_v48 }
 0x153   : > { %v1244_v53 = vpop.permute.xlu1 %1243  ;;  %v1239_v54 = vpop.permute.xlu0 %1238 }
 0x154   : > { %v2405_v55 = vadd.f32 %v3276_v49, %v1244_v53  ;;  %v2404_v56 = vadd.f32 %v3275_v50, %v1239_v54  ;;  %1563 = vperm.xlu1 %3373, %v805_v51   ;;  %1558 = vperm.xlu0 %3372, %v804_v52   ;;  %v3296_v49 = vld [vmem:[%s4769_s1 + $0x51] ss:$0 sm:$0xff]  ;;  %v3295_v50 = vld [vmem:[%s4769_s1 + $0x50] ss:$0 sm:$0xff] }
 0x156   : > { %2534 = vst.msk [vmem:[%s3803_s8 + $0x1e8] sm:$0xff] %vm2472_vm0, %v2405_v55  ;;  %2533 = vst.msk [vmem:[%s3803_s8 + $0x1e0] sm:$0xff] %vm2472_vm0, %v2404_v56  ;;  %v3298_v55 = vld [vmem:[%s4769_s1 + $0x53] ss:$0 sm:$0xff]  ;;  %v3297_v56 = vld [vmem:[%s4769_s1 + $0x52] ss:$0 sm:$0xff] }
 0x157   : > { %v1254_v61 = vpop.permute.xlu1 %1253  ;;  %v1249_v62 = vpop.permute.xlu0 %1248 }
 0x158   : > { %v2407_v63 = vadd.f32 %v3278_v57, %v1254_v61  ;;  %v2406_v0 = vadd.f32 %v3277_v58, %v1249_v62  ;;  %1573 = vperm.xlu1 %3373, %v807_v59   ;;  %1568 = vperm.xlu0 %3372, %v806_v60   ;;  %v3300_v61 = vld [vmem:[%s4769_s1 + $0x55] ss:$0 sm:$0xff]  ;;  %v3299_v62 = vld [vmem:[%s4769_s1 + $0x54] ss:$0 sm:$0xff] }
 0x15a   : > { %2536 = vst.msk [vmem:[%s3803_s8 + $0x1f8] sm:$0xff] %vm2472_vm0, %v2407_v63  ;;  %2535 = vst.msk [vmem:[%s3803_s8 + $0x1f0] sm:$0xff] %vm2472_vm0, %v2406_v0 }
 0x15b   : > { %v1264_v3 = vpop.permute.xlu1 %1263  ;;  %v1259_v4 = vpop.permute.xlu0 %1258 }
 0x15c   : > { %v2409_v5 = vadd.f32 %v3280_v1, %v1264_v3  ;;  %v2408_v6 = vadd.f32 %v3279_v2, %v1259_v4  ;;  %v3302_v3 = vld [vmem:[%s4769_s1 + $0x57] ss:$0 sm:$0xff]  ;;  %v3301_v4 = vld [vmem:[%s4769_s1 + $0x56] ss:$0 sm:$0xff] }
 0x15e   : > { %2538 = vst.msk [vmem:[%s3803_s8 + $0x208] sm:$0xff] %vm2472_vm0, %v2409_v5  ;;  %2537 = vst.msk [vmem:[%s3803_s8 + $0x200] sm:$0xff] %vm2472_vm0, %v2408_v6 }
 0x15f   : > { %v1274_v9 = vpop.permute.xlu1 %1273  ;;  %v1269_v10 = vpop.permute.xlu0 %1268 }
 0x160   : > { %v2411_v11 = vadd.f32 %v3282_v7, %v1274_v9  ;;  %v2410_v12 = vadd.f32 %v3281_v8, %v1269_v10  ;;  %v3304_v9 = vld [vmem:[%s4769_s1 + $0x59] ss:$0 sm:$0xff]  ;;  %v3303_v10 = vld [vmem:[%s4769_s1 + $0x58] ss:$0 sm:$0xff] }
 0x162   : > { %2540 = vst.msk [vmem:[%s3803_s8 + $0x218] sm:$0xff] %vm2472_vm0, %v2411_v11  ;;  %2539 = vst.msk [vmem:[%s3803_s8 + $0x210] sm:$0xff] %vm2472_vm0, %v2410_v12 }
 0x163   : > { %v1284_v15 = vpop.permute.xlu1 %1283  ;;  %v1279_v16 = vpop.permute.xlu0 %1278 }
 0x164   : > { %v2413_v17 = vadd.f32 %v3284_v13, %v1284_v15  ;;  %v2412_v18 = vadd.f32 %v3283_v14, %v1279_v16  ;;  %v3306_v15 = vld [vmem:[%s4769_s1 + $0x5b] ss:$0 sm:$0xff]  ;;  %v3305_v16 = vld [vmem:[%s4769_s1 + $0x5a] ss:$0 sm:$0xff] }
 0x166   : > { %2542 = vst.msk [vmem:[%s3803_s8 + $0x228] sm:$0xff] %vm2472_vm0, %v2413_v17  ;;  %2541 = vst.msk [vmem:[%s3803_s8 + $0x220] sm:$0xff] %vm2472_vm0, %v2412_v18 }
 0x167   : > { %v1294_v21 = vpop.permute.xlu1 %1293  ;;  %v1289_v22 = vpop.permute.xlu0 %1288 }
 0x168   : > { %v2415_v23 = vadd.f32 %v3286_v19, %v1294_v21  ;;  %v2414_v24 = vadd.f32 %v3285_v20, %v1289_v22  ;;  %v3308_v21 = vld [vmem:[%s4769_s1 + $0x5d] ss:$0 sm:$0xff]  ;;  %v3307_v22 = vld [vmem:[%s4769_s1 + $0x5c] ss:$0 sm:$0xff] }
 0x16a   : > { %2544 = vst.msk [vmem:[%s3803_s8 + $0x238] sm:$0xff] %vm2472_vm0, %v2415_v23  ;;  %2543 = vst.msk [vmem:[%s3803_s8 + $0x230] sm:$0xff] %vm2472_vm0, %v2414_v24 }
 0x16b   : > { %v1304_v27 = vpop.permute.xlu1 %1303  ;;  %v1299_v28 = vpop.permute.xlu0 %1298 }
 0x16c   : > { %v2417_v29 = vadd.f32 %v3288_v25, %v1304_v27  ;;  %v2416_v30 = vadd.f32 %v3287_v26, %v1299_v28  ;;  %v3310_v27 = vld [vmem:[%s4769_s1 + $0x5f] ss:$0 sm:$0xff]  ;;  %v3309_v28 = vld [vmem:[%s4769_s1 + $0x5e] ss:$0 sm:$0xff] }
 0x16e   : > { %2546 = vst.msk [vmem:[%s3803_s8 + $0x248] sm:$0xff] %vm2472_vm0, %v2417_v29  ;;  %2545 = vst.msk [vmem:[%s3803_s8 + $0x240] sm:$0xff] %vm2472_vm0, %v2416_v30 }
 0x16f   : > { %v1314_v33 = vpop.permute.xlu1 %1313  ;;  %v1309_v34 = vpop.permute.xlu0 %1308 }
 0x170   : > { %v2419_v35 = vadd.f32 %v3290_v31, %v1314_v33  ;;  %v2418_v36 = vadd.f32 %v3289_v32, %v1309_v34  ;;  %v3312_v33 = vld [vmem:[%s4769_s1 + $0x61] ss:$0 sm:$0xff]  ;;  %v3311_v34 = vld [vmem:[%s4769_s1 + $0x60] ss:$0 sm:$0xff] }
 0x172   : > { %2548 = vst.msk [vmem:[%s3803_s8 + $0x258] sm:$0xff] %vm2472_vm0, %v2419_v35  ;;  %2547 = vst.msk [vmem:[%s3803_s8 + $0x250] sm:$0xff] %vm2472_vm0, %v2418_v36 }
 0x173   : > { %v1324_v39 = vpop.permute.xlu1 %1323  ;;  %v1319_v40 = vpop.permute.xlu0 %1318 }
 0x174   : > { %v2421_v41 = vadd.f32 %v3292_v37, %v1324_v39  ;;  %v2420_v42 = vadd.f32 %v3291_v38, %v1319_v40  ;;  %v3314_v39 = vld [vmem:[%s4769_s1 + $0x63] ss:$0 sm:$0xff]  ;;  %v3313_v40 = vld [vmem:[%s4769_s1 + $0x62] ss:$0 sm:$0xff] }
 0x176   : > { %2550 = vst.msk [vmem:[%s3803_s8 + $0x268] sm:$0xff] %vm2472_vm0, %v2421_v41  ;;  %2549 = vst.msk [vmem:[%s3803_s8 + $0x260] sm:$0xff] %vm2472_vm0, %v2420_v42 }
 0x177   : > { %v1334_v45 = vpop.permute.xlu1 %1333  ;;  %v1329_v46 = vpop.permute.xlu0 %1328 }
 0x178   : > { %v2423_v47 = vadd.f32 %v3294_v43, %v1334_v45  ;;  %v2422_v48 = vadd.f32 %v3293_v44, %v1329_v46  ;;  %v3316_v45 = vld [vmem:[%s4769_s1 + $0x65] ss:$0 sm:$0xff]  ;;  %v3315_v46 = vld [vmem:[%s4769_s1 + $0x64] ss:$0 sm:$0xff] }
 0x17a   : > { %2552 = vst.msk [vmem:[%s3803_s8 + $0x278] sm:$0xff] %vm2472_vm0, %v2423_v47  ;;  %2551 = vst.msk [vmem:[%s3803_s8 + $0x270] sm:$0xff] %vm2472_vm0, %v2422_v48 }
 0x17b   : > { %v1344_v51 = vpop.permute.xlu1 %1343  ;;  %v1339_v52 = vpop.permute.xlu0 %1338 }
 0x17c   : > { %v2425_v53 = vadd.f32 %v3296_v49, %v1344_v51  ;;  %v2424_v54 = vadd.f32 %v3295_v50, %v1339_v52  ;;  %v3318_v51 = vld [vmem:[%s4769_s1 + $0x67] ss:$0 sm:$0xff]  ;;  %v3317_v52 = vld [vmem:[%s4769_s1 + $0x66] ss:$0 sm:$0xff] }
 0x17e   : > { %2554 = vst.msk [vmem:[%s3803_s8 + $0x288] sm:$0xff] %vm2472_vm0, %v2425_v53  ;;  %2553 = vst.msk [vmem:[%s3803_s8 + $0x280] sm:$0xff] %vm2472_vm0, %v2424_v54 }
 0x17f   : > { %v1354_v57 = vpop.permute.xlu1 %1353  ;;  %v1349_v58 = vpop.permute.xlu0 %1348 }
 0x180   : > { %v2427_v59 = vadd.f32 %v3298_v55, %v1354_v57  ;;  %v2426_v60 = vadd.f32 %v3297_v56, %v1349_v58  ;;  %v3320_v57 = vld [vmem:[%s4769_s1 + $0x69] ss:$0 sm:$0xff]  ;;  %v3319_v58 = vld [vmem:[%s4769_s1 + $0x68] ss:$0 sm:$0xff] }
 0x182   : > { %2556 = vst.msk [vmem:[%s3803_s8 + $0x298] sm:$0xff] %vm2472_vm0, %v2427_v59  ;;  %2555 = vst.msk [vmem:[%s3803_s8 + $0x290] sm:$0xff] %vm2472_vm0, %v2426_v60 }
 0x183   : > { %v1364_v63 = vpop.permute.xlu1 %1363  ;;  %v1359_v0 = vpop.permute.xlu0 %1358 }
 0x184   : > { %v2429_v1 = vadd.f32 %v3300_v61, %v1364_v63  ;;  %v2428_v2 = vadd.f32 %v3299_v62, %v1359_v0  ;;  %v3322_v63 = vld [vmem:[%s4769_s1 + $0x6b] ss:$0 sm:$0xff]  ;;  %v3321_v0 = vld [vmem:[%s4769_s1 + $0x6a] ss:$0 sm:$0xff] }
 0x186   : > { %2558 = vst.msk [vmem:[%s3803_s8 + $0x2a8] sm:$0xff] %vm2472_vm0, %v2429_v1  ;;  %2557 = vst.msk [vmem:[%s3803_s8 + $0x2a0] sm:$0xff] %vm2472_vm0, %v2428_v2 }
 0x187   : > { %v1374_v5 = vpop.permute.xlu1 %1373  ;;  %v1369_v6 = vpop.permute.xlu0 %1368 }
 0x188   : > { %v2431_v7 = vadd.f32 %v3302_v3, %v1374_v5  ;;  %v2430_v8 = vadd.f32 %v3301_v4, %v1369_v6  ;;  %v3324_v5 = vld [vmem:[%s4769_s1 + $0x6d] ss:$0 sm:$0xff]  ;;  %v3323_v6 = vld [vmem:[%s4769_s1 + $0x6c] ss:$0 sm:$0xff] }
 0x18a   : > { %2560 = vst.msk [vmem:[%s3803_s8 + $0x2b8] sm:$0xff] %vm2472_vm0, %v2431_v7  ;;  %2559 = vst.msk [vmem:[%s3803_s8 + $0x2b0] sm:$0xff] %vm2472_vm0, %v2430_v8 }
 0x18b   : > { %v1384_v11 = vpop.permute.xlu1 %1383  ;;  %v1379_v12 = vpop.permute.xlu0 %1378 }
 0x18c   : > { %v2433_v13 = vadd.f32 %v3304_v9, %v1384_v11  ;;  %v2432_v14 = vadd.f32 %v3303_v10, %v1379_v12  ;;  %v3326_v11 = vld [vmem:[%s4769_s1 + $0x6f] ss:$0 sm:$0xff]  ;;  %v3325_v12 = vld [vmem:[%s4769_s1 + $0x6e] ss:$0 sm:$0xff] }
 0x18e   : > { %2562 = vst.msk [vmem:[%s3803_s8 + $0x2c8] sm:$0xff] %vm2472_vm0, %v2433_v13  ;;  %2561 = vst.msk [vmem:[%s3803_s8 + $0x2c0] sm:$0xff] %vm2472_vm0, %v2432_v14 }
 0x18f   : > { %v1394_v17 = vpop.permute.xlu1 %1393  ;;  %v1389_v18 = vpop.permute.xlu0 %1388 }
 0x190   : > { %v2435_v19 = vadd.f32 %v3306_v15, %v1394_v17  ;;  %v2434_v20 = vadd.f32 %v3305_v16, %v1389_v18  ;;  %v3328_v17 = vld [vmem:[%s4769_s1 + $0x71] ss:$0 sm:$0xff]  ;;  %v3327_v18 = vld [vmem:[%s4769_s1 + $0x70] ss:$0 sm:$0xff] }
 0x192   : > { %2564 = vst.msk [vmem:[%s3803_s8 + $0x2d8] sm:$0xff] %vm2472_vm0, %v2435_v19  ;;  %2563 = vst.msk [vmem:[%s3803_s8 + $0x2d0] sm:$0xff] %vm2472_vm0, %v2434_v20 }
 0x193   : > { %v1404_v23 = vpop.permute.xlu1 %1403  ;;  %v1399_v24 = vpop.permute.xlu0 %1398 }
 0x194   : > { %v2437_v25 = vadd.f32 %v3308_v21, %v1404_v23  ;;  %v2436_v26 = vadd.f32 %v3307_v22, %v1399_v24  ;;  %v3330_v23 = vld [vmem:[%s4769_s1 + $0x73] ss:$0 sm:$0xff]  ;;  %v3329_v24 = vld [vmem:[%s4769_s1 + $0x72] ss:$0 sm:$0xff] }
 0x196   : > { %2566 = vst.msk [vmem:[%s3803_s8 + $0x2e8] sm:$0xff] %vm2472_vm0, %v2437_v25  ;;  %2565 = vst.msk [vmem:[%s3803_s8 + $0x2e0] sm:$0xff] %vm2472_vm0, %v2436_v26 }
 0x197   : > { %v1414_v29 = vpop.permute.xlu1 %1413  ;;  %v1409_v30 = vpop.permute.xlu0 %1408 }
 0x198   : > { %v2439_v31 = vadd.f32 %v3310_v27, %v1414_v29  ;;  %v2438_v32 = vadd.f32 %v3309_v28, %v1409_v30  ;;  %v3332_v29 = vld [vmem:[%s4769_s1 + $0x75] ss:$0 sm:$0xff]  ;;  %v3331_v30 = vld [vmem:[%s4769_s1 + $0x74] ss:$0 sm:$0xff] }
 0x19a   : > { %2568 = vst.msk [vmem:[%s3803_s8 + $0x2f8] sm:$0xff] %vm2472_vm0, %v2439_v31  ;;  %2567 = vst.msk [vmem:[%s3803_s8 + $0x2f0] sm:$0xff] %vm2472_vm0, %v2438_v32 }
 0x19b   : > { %v1424_v35 = vpop.permute.xlu1 %1423  ;;  %v1419_v36 = vpop.permute.xlu0 %1418 }
 0x19c   : > { %v2441_v37 = vadd.f32 %v3312_v33, %v1424_v35  ;;  %v2440_v38 = vadd.f32 %v3311_v34, %v1419_v36  ;;  %v3334_v35 = vld [vmem:[%s4769_s1 + $0x77] ss:$0 sm:$0xff]  ;;  %v3333_v36 = vld [vmem:[%s4769_s1 + $0x76] ss:$0 sm:$0xff] }
 0x19e   : > { %2570 = vst.msk [vmem:[%s3803_s8 + $0x308] sm:$0xff] %vm2472_vm0, %v2441_v37  ;;  %2569 = vst.msk [vmem:[%s3803_s8 + $0x300] sm:$0xff] %vm2472_vm0, %v2440_v38 }
 0x19f   : > { %v1434_v41 = vpop.permute.xlu1 %1433  ;;  %v1429_v42 = vpop.permute.xlu0 %1428 }
 0x1a0   : > { %v2443_v43 = vadd.f32 %v3314_v39, %v1434_v41  ;;  %v2442_v44 = vadd.f32 %v3313_v40, %v1429_v42  ;;  %v3336_v41 = vld [vmem:[%s4769_s1 + $0x79] ss:$0 sm:$0xff]  ;;  %v3335_v42 = vld [vmem:[%s4769_s1 + $0x78] ss:$0 sm:$0xff] }
 0x1a2   : > { %2572 = vst.msk [vmem:[%s3803_s8 + $0x318] sm:$0xff] %vm2472_vm0, %v2443_v43  ;;  %2571 = vst.msk [vmem:[%s3803_s8 + $0x310] sm:$0xff] %vm2472_vm0, %v2442_v44 }
 0x1a3   : > { %v1444_v47 = vpop.permute.xlu1 %1443  ;;  %v1439_v48 = vpop.permute.xlu0 %1438 }
 0x1a4   : > { %v2445_v49 = vadd.f32 %v3316_v45, %v1444_v47  ;;  %v2444_v50 = vadd.f32 %v3315_v46, %v1439_v48  ;;  %v3338_v47 = vld [vmem:[%s4769_s1 + $0x7b] ss:$0 sm:$0xff]  ;;  %v3337_v48 = vld [vmem:[%s4769_s1 + $0x7a] ss:$0 sm:$0xff] }
 0x1a6   : > { %2574 = vst.msk [vmem:[%s3803_s8 + $0x328] sm:$0xff] %vm2472_vm0, %v2445_v49  ;;  %2573 = vst.msk [vmem:[%s3803_s8 + $0x320] sm:$0xff] %vm2472_vm0, %v2444_v50 }
 0x1a7   : > { %v1454_v53 = vpop.permute.xlu1 %1453  ;;  %v1449_v54 = vpop.permute.xlu0 %1448 }
 0x1a8   : > { %v2447_v55 = vadd.f32 %v3318_v51, %v1454_v53  ;;  %v2446_v56 = vadd.f32 %v3317_v52, %v1449_v54  ;;  %v3340_v53 = vld [vmem:[%s4769_s1 + $0x7d] ss:$0 sm:$0xff]  ;;  %v3339_v54 = vld [vmem:[%s4769_s1 + $0x7c] ss:$0 sm:$0xff] }
 0x1aa   : > { %2576 = vst.msk [vmem:[%s3803_s8 + $0x338] sm:$0xff] %vm2472_vm0, %v2447_v55  ;;  %2575 = vst.msk [vmem:[%s3803_s8 + $0x330] sm:$0xff] %vm2472_vm0, %v2446_v56 }
 0x1ab   : > { %v1464_v59 = vpop.permute.xlu1 %1463  ;;  %v1459_v60 = vpop.permute.xlu0 %1458 }
 0x1ac   : > { %v2449_v61 = vadd.f32 %v3320_v57, %v1464_v59  ;;  %v2448_v62 = vadd.f32 %v3319_v58, %v1459_v60  ;;  %v3342_v59 = vld [vmem:[%s4769_s1 + $0x7f] ss:$0 sm:$0xff]  ;;  %v3341_v60 = vld [vmem:[%s4769_s1 + $0x7e] ss:$0 sm:$0xff] }
 0x1ae   : > { %2578 = vst.msk [vmem:[%s3803_s8 + $0x348] sm:$0xff] %vm2472_vm0, %v2449_v61  ;;  %2577 = vst.msk [vmem:[%s3803_s8 + $0x340] sm:$0xff] %vm2472_vm0, %v2448_v62 }
 0x1af   : > { %v1474_v1 = vpop.permute.xlu1 %1473  ;;  %v1469_v2 = vpop.permute.xlu0 %1468 }
 0x1b0   : > { %v2451_v3 = vadd.f32 %v3322_v63, %v1474_v1  ;;  %v2450_v4 = vadd.f32 %v3321_v0, %v1469_v2  ;;  %v2891_v1 = vld [vmem:[%s3803_s8] sm:$0xff] (%p3444_p5)  ;;  %v2893_v2 = vld [vmem:[%s3803_s8 + $0x8] sm:$0xff] (%p3444_p5) }
 0x1b1   : > { %2892 = vst [vmem:[%s4503_s17] sm:$0xff] (%p3444_p5), %v2891_v1  ;;  %2894 = vst [vmem:[%s4503_s17 + $0x10] sm:$0xff] (%p3444_p5), %v2893_v2  ;;  %v3019_v1 = vld [vmem:[%s3803_s8 + $0x200] sm:$0xff] (%p3444_p5)  ;;  %v3021_v2 = vld [vmem:[%s3803_s8 + $0x208] sm:$0xff] (%p3444_p5) }
 0x1b2   : > { %2580 = vst.msk [vmem:[%s3803_s8 + $0x358] sm:$0xff] %vm2472_vm0, %v2451_v3  ;;  %2579 = vst.msk [vmem:[%s3803_s8 + $0x350] sm:$0xff] %vm2472_vm0, %v2450_v4  ;;  %v2895_v3 = vld [vmem:[%s3803_s8 + $0x10] sm:$0xff] (%p3444_p5)  ;;  %v2897_v4 = vld [vmem:[%s3803_s8 + $0x18] sm:$0xff] (%p3444_p5) }
 0x1b3   : > { %v1484_v7 = vpop.permute.xlu1 %1483  ;;  %v1479_v8 = vpop.permute.xlu0 %1478  ;;  %2896 = vst [vmem:[%s4503_s17 + $0x20] sm:$0xff] (%p3444_p5), %v2895_v3  ;;  %2898 = vst [vmem:[%s4503_s17 + $0x30] sm:$0xff] (%p3444_p5), %v2897_v4  ;;  %v3023_v3 = vld [vmem:[%s3803_s8 + $0x210] sm:$0xff] (%p3444_p5)  ;;  %v3025_v4 = vld [vmem:[%s3803_s8 + $0x218] sm:$0xff] (%p3444_p5) }
 0x1b4   : > { %v2453_v9 = vadd.f32 %v3324_v5, %v1484_v7  ;;  %v2452_v10 = vadd.f32 %v3323_v6, %v1479_v8  ;;  %v2899_v5 = vld [vmem:[%s3803_s8 + $0x20] sm:$0xff] (%p3444_p5)  ;;  %v2901_v6 = vld [vmem:[%s3803_s8 + $0x28] sm:$0xff] (%p3444_p5)  ;;  %v2903_v7 = vld [vmem:[%s3803_s8 + $0x30] sm:$0xff] (%p3444_p5)  ;;  %3020 = vst [vmem:[%s4503_s17 + $0x400] sm:$0xff] (%p3444_p5), %v3019_v1 }
 0x1b5   : > { %2900 = vst [vmem:[%s4503_s17 + $0x40] sm:$0xff] (%p3444_p5), %v2899_v5  ;;  %2902 = vst [vmem:[%s4503_s17 + $0x50] sm:$0xff] (%p3444_p5), %v2901_v6  ;;  %v2905_v8 = vld [vmem:[%s3803_s8 + $0x38] sm:$0xff] (%p3444_p5)  ;;  %v3027_v5 = vld [vmem:[%s3803_s8 + $0x220] sm:$0xff] (%p3444_p5) }
 0x1b6   : > { %2582 = vst.msk [vmem:[%s3803_s8 + $0x368] sm:$0xff] %vm2472_vm0, %v2453_v9  ;;  %2581 = vst.msk [vmem:[%s3803_s8 + $0x360] sm:$0xff] %vm2472_vm0, %v2452_v10  ;;  %v2907_v9 = vld [vmem:[%s3803_s8 + $0x40] sm:$0xff] (%p3444_p5)  ;;  %v2909_v10 = vld [vmem:[%s3803_s8 + $0x48] sm:$0xff] (%p3444_p5) }
 0x1b7   : > { %v1494_v13 = vpop.permute.xlu1 %1493  ;;  %v1489_v14 = vpop.permute.xlu0 %1488  ;;  %2904 = vst [vmem:[%s4503_s17 + $0x60] sm:$0xff] (%p3444_p5), %v2903_v7  ;;  %2906 = vst [vmem:[%s4503_s17 + $0x70] sm:$0xff] (%p3444_p5), %v2905_v8  ;;  %v3029_v6 = vld [vmem:[%s3803_s8 + $0x228] sm:$0xff] (%p3444_p5)  ;;  %v3031_v7 = vld [vmem:[%s3803_s8 + $0x230] sm:$0xff] (%p3444_p5) }
 0x1b8   : > { %v2455_v15 = vadd.f32 %v3326_v11, %v1494_v13  ;;  %v2454_v16 = vadd.f32 %v3325_v12, %v1489_v14  ;;  %2908 = vst [vmem:[%s4503_s17 + $0x80] sm:$0xff] (%p3444_p5), %v2907_v9  ;;  %v2911_v11 = vld [vmem:[%s3803_s8 + $0x50] sm:$0xff] (%p3444_p5)  ;;  %v2913_v12 = vld [vmem:[%s3803_s8 + $0x58] sm:$0xff] (%p3444_p5)  ;;  %2910 = vst [vmem:[%s4503_s17 + $0x90] sm:$0xff] (%p3444_p5), %v2909_v10 }
 0x1b9   : > { %2912 = vst [vmem:[%s4503_s17 + $0xa0] sm:$0xff] (%p3444_p5), %v2911_v11  ;;  %2914 = vst [vmem:[%s4503_s17 + $0xb0] sm:$0xff] (%p3444_p5), %v2913_v12  ;;  %v2915_v13 = vld [vmem:[%s3803_s8 + $0x60] sm:$0xff] (%p3444_p5)  ;;  %v2917_v14 = vld [vmem:[%s3803_s8 + $0x68] sm:$0xff] (%p3444_p5) }
 0x1ba   : > { %2584 = vst.msk [vmem:[%s3803_s8 + $0x378] sm:$0xff] %vm2472_vm0, %v2455_v15  ;;  %2583 = vst.msk [vmem:[%s3803_s8 + $0x370] sm:$0xff] %vm2472_vm0, %v2454_v16  ;;  %v2919_v15 = vld [vmem:[%s3803_s8 + $0x70] sm:$0xff] (%p3444_p5)  ;;  %v2921_v16 = vld [vmem:[%s3803_s8 + $0x78] sm:$0xff] (%p3444_p5) }
 0x1bb   : > { %v1504_v19 = vpop.permute.xlu1 %1503  ;;  %v1499_v20 = vpop.permute.xlu0 %1498  ;;  %2916 = vst [vmem:[%s4503_s17 + $0xc0] sm:$0xff] (%p3444_p5), %v2915_v13  ;;  %2918 = vst [vmem:[%s4503_s17 + $0xd0] sm:$0xff] (%p3444_p5), %v2917_v14  ;;  %v3033_v8 = vld [vmem:[%s3803_s8 + $0x238] sm:$0xff] (%p3444_p5)  ;;  %v3035_v9 = vld [vmem:[%s3803_s8 + $0x240] sm:$0xff] (%p3444_p5) }
 0x1bc   : > { %v2457_v21 = vadd.f32 %v3328_v17, %v1504_v19  ;;  %v2456_v22 = vadd.f32 %v3327_v18, %v1499_v20  ;;  %2920 = vst [vmem:[%s4503_s17 + $0xe0] sm:$0xff] (%p3444_p5), %v2919_v15  ;;  %v2923_v17 = vld [vmem:[%s3803_s8 + $0x80] sm:$0xff] (%p3444_p5)  ;;  %v2925_v18 = vld [vmem:[%s3803_s8 + $0x88] sm:$0xff] (%p3444_p5)  ;;  %2922 = vst [vmem:[%s4503_s17 + $0xf0] sm:$0xff] (%p3444_p5), %v2921_v16 }
 0x1bd   : > { %2924 = vst [vmem:[%s4503_s17 + $0x100] sm:$0xff] (%p3444_p5), %v2923_v17  ;;  %2926 = vst [vmem:[%s4503_s17 + $0x110] sm:$0xff] (%p3444_p5), %v2925_v18  ;;  %v2927_v19 = vld [vmem:[%s3803_s8 + $0x90] sm:$0xff] (%p3444_p5)  ;;  %v2929_v20 = vld [vmem:[%s3803_s8 + $0x98] sm:$0xff] (%p3444_p5) }
 0x1be   : > { %2586 = vst.msk [vmem:[%s3803_s8 + $0x388] sm:$0xff] %vm2472_vm0, %v2457_v21  ;;  %2585 = vst.msk [vmem:[%s3803_s8 + $0x380] sm:$0xff] %vm2472_vm0, %v2456_v22  ;;  %v2931_v21 = vld [vmem:[%s3803_s8 + $0xa0] sm:$0xff] (%p3444_p5)  ;;  %v2933_v22 = vld [vmem:[%s3803_s8 + $0xa8] sm:$0xff] (%p3444_p5) }
 0x1bf   : > { %v1514_v25 = vpop.permute.xlu1 %1513  ;;  %v1509_v26 = vpop.permute.xlu0 %1508  ;;  %2928 = vst [vmem:[%s4503_s17 + $0x120] sm:$0xff] (%p3444_p5), %v2927_v19  ;;  %2930 = vst [vmem:[%s4503_s17 + $0x130] sm:$0xff] (%p3444_p5), %v2929_v20  ;;  %v3037_v10 = vld [vmem:[%s3803_s8 + $0x248] sm:$0xff] (%p3444_p5)  ;;  %v3039_v11 = vld [vmem:[%s3803_s8 + $0x250] sm:$0xff] (%p3444_p5) }
 0x1c0   : > { %v2459_v27 = vadd.f32 %v3330_v23, %v1514_v25  ;;  %v2458_v28 = vadd.f32 %v3329_v24, %v1509_v26  ;;  %2932 = vst [vmem:[%s4503_s17 + $0x140] sm:$0xff] (%p3444_p5), %v2931_v21  ;;  %v2935_v23 = vld [vmem:[%s3803_s8 + $0xb0] sm:$0xff] (%p3444_p5)  ;;  %v2937_v24 = vld [vmem:[%s3803_s8 + $0xb8] sm:$0xff] (%p3444_p5)  ;;  %2934 = vst [vmem:[%s4503_s17 + $0x150] sm:$0xff] (%p3444_p5), %v2933_v22 }
 0x1c1   : > { %2936 = vst [vmem:[%s4503_s17 + $0x160] sm:$0xff] (%p3444_p5), %v2935_v23  ;;  %2938 = vst [vmem:[%s4503_s17 + $0x170] sm:$0xff] (%p3444_p5), %v2937_v24  ;;  %v2939_v25 = vld [vmem:[%s3803_s8 + $0xc0] sm:$0xff] (%p3444_p5)  ;;  %v2941_v26 = vld [vmem:[%s3803_s8 + $0xc8] sm:$0xff] (%p3444_p5) }
 0x1c2   : > { %2588 = vst.msk [vmem:[%s3803_s8 + $0x398] sm:$0xff] %vm2472_vm0, %v2459_v27  ;;  %2587 = vst.msk [vmem:[%s3803_s8 + $0x390] sm:$0xff] %vm2472_vm0, %v2458_v28  ;;  %v2943_v27 = vld [vmem:[%s3803_s8 + $0xd0] sm:$0xff] (%p3444_p5)  ;;  %v2945_v28 = vld [vmem:[%s3803_s8 + $0xd8] sm:$0xff] (%p3444_p5) }
 0x1c3   : > { %v1524_v31 = vpop.permute.xlu1 %1523  ;;  %v1519_v32 = vpop.permute.xlu0 %1518  ;;  %2940 = vst [vmem:[%s4503_s17 + $0x180] sm:$0xff] (%p3444_p5), %v2939_v25  ;;  %2942 = vst [vmem:[%s4503_s17 + $0x190] sm:$0xff] (%p3444_p5), %v2941_v26  ;;  %v3041_v12 = vld [vmem:[%s3803_s8 + $0x258] sm:$0xff] (%p3444_p5)  ;;  %v3043_v13 = vld [vmem:[%s3803_s8 + $0x260] sm:$0xff] (%p3444_p5) }
 0x1c4   : > { %v2461_v33 = vadd.f32 %v3332_v29, %v1524_v31  ;;  %v2460_v34 = vadd.f32 %v3331_v30, %v1519_v32  ;;  %2944 = vst [vmem:[%s4503_s17 + $0x1a0] sm:$0xff] (%p3444_p5), %v2943_v27  ;;  %v2947_v29 = vld [vmem:[%s3803_s8 + $0xe0] sm:$0xff] (%p3444_p5)  ;;  %v2949_v30 = vld [vmem:[%s3803_s8 + $0xe8] sm:$0xff] (%p3444_p5)  ;;  %2946 = vst [vmem:[%s4503_s17 + $0x1b0] sm:$0xff] (%p3444_p5), %v2945_v28 }
 0x1c5   : > { %2948 = vst [vmem:[%s4503_s17 + $0x1c0] sm:$0xff] (%p3444_p5), %v2947_v29  ;;  %2950 = vst [vmem:[%s4503_s17 + $0x1d0] sm:$0xff] (%p3444_p5), %v2949_v30  ;;  %v2951_v31 = vld [vmem:[%s3803_s8 + $0xf0] sm:$0xff] (%p3444_p5)  ;;  %v2953_v32 = vld [vmem:[%s3803_s8 + $0xf8] sm:$0xff] (%p3444_p5) }
 0x1c6   : > { %2590 = vst.msk [vmem:[%s3803_s8 + $0x3a8] sm:$0xff] %vm2472_vm0, %v2461_v33  ;;  %2589 = vst.msk [vmem:[%s3803_s8 + $0x3a0] sm:$0xff] %vm2472_vm0, %v2460_v34  ;;  %v2955_v33 = vld [vmem:[%s3803_s8 + $0x100] sm:$0xff] (%p3444_p5)  ;;  %v2957_v34 = vld [vmem:[%s3803_s8 + $0x108] sm:$0xff] (%p3444_p5) }
 0x1c7   : > { %v1534_v37 = vpop.permute.xlu1 %1533  ;;  %v1529_v38 = vpop.permute.xlu0 %1528  ;;  %2952 = vst [vmem:[%s4503_s17 + $0x1e0] sm:$0xff] (%p3444_p5), %v2951_v31  ;;  %2954 = vst [vmem:[%s4503_s17 + $0x1f0] sm:$0xff] (%p3444_p5), %v2953_v32  ;;  %v3045_v14 = vld [vmem:[%s3803_s8 + $0x268] sm:$0xff] (%p3444_p5)  ;;  %v3047_v15 = vld [vmem:[%s3803_s8 + $0x270] sm:$0xff] (%p3444_p5) }
 0x1c8   : > { %v2463_v39 = vadd.f32 %v3334_v35, %v1534_v37  ;;  %v2462_v40 = vadd.f32 %v3333_v36, %v1529_v38  ;;  %2956 = vst [vmem:[%s4503_s17 + $0x200] sm:$0xff] (%p3444_p5), %v2955_v33  ;;  %v2959_v35 = vld [vmem:[%s3803_s8 + $0x110] sm:$0xff] (%p3444_p5)  ;;  %v2961_v36 = vld [vmem:[%s3803_s8 + $0x118] sm:$0xff] (%p3444_p5)  ;;  %2958 = vst [vmem:[%s4503_s17 + $0x210] sm:$0xff] (%p3444_p5), %v2957_v34 }
 0x1c9   : > { %2960 = vst [vmem:[%s4503_s17 + $0x220] sm:$0xff] (%p3444_p5), %v2959_v35  ;;  %2962 = vst [vmem:[%s4503_s17 + $0x230] sm:$0xff] (%p3444_p5), %v2961_v36  ;;  %v2963_v37 = vld [vmem:[%s3803_s8 + $0x120] sm:$0xff] (%p3444_p5)  ;;  %v2965_v38 = vld [vmem:[%s3803_s8 + $0x128] sm:$0xff] (%p3444_p5) }
 0x1ca   : > { %2592 = vst.msk [vmem:[%s3803_s8 + $0x3b8] sm:$0xff] %vm2472_vm0, %v2463_v39  ;;  %2591 = vst.msk [vmem:[%s3803_s8 + $0x3b0] sm:$0xff] %vm2472_vm0, %v2462_v40  ;;  %v2967_v39 = vld [vmem:[%s3803_s8 + $0x130] sm:$0xff] (%p3444_p5)  ;;  %v2969_v40 = vld [vmem:[%s3803_s8 + $0x138] sm:$0xff] (%p3444_p5) }
 0x1cb   : > { %v1544_v43 = vpop.permute.xlu1 %1543  ;;  %v1539_v44 = vpop.permute.xlu0 %1538  ;;  %2964 = vst [vmem:[%s4503_s17 + $0x240] sm:$0xff] (%p3444_p5), %v2963_v37  ;;  %2966 = vst [vmem:[%s4503_s17 + $0x250] sm:$0xff] (%p3444_p5), %v2965_v38  ;;  %v3049_v16 = vld [vmem:[%s3803_s8 + $0x278] sm:$0xff] (%p3444_p5)  ;;  %v3051_v17 = vld [vmem:[%s3803_s8 + $0x280] sm:$0xff] (%p3444_p5) }
 0x1cc   : > { %v2465_v45 = vadd.f32 %v3336_v41, %v1544_v43  ;;  %v2464_v46 = vadd.f32 %v3335_v42, %v1539_v44  ;;  %2968 = vst [vmem:[%s4503_s17 + $0x260] sm:$0xff] (%p3444_p5), %v2967_v39  ;;  %v2971_v41 = vld [vmem:[%s3803_s8 + $0x140] sm:$0xff] (%p3444_p5)  ;;  %v2973_v42 = vld [vmem:[%s3803_s8 + $0x148] sm:$0xff] (%p3444_p5)  ;;  %2970 = vst [vmem:[%s4503_s17 + $0x270] sm:$0xff] (%p3444_p5), %v2969_v40 }
 0x1cd   : > { %2972 = vst [vmem:[%s4503_s17 + $0x280] sm:$0xff] (%p3444_p5), %v2971_v41  ;;  %2974 = vst [vmem:[%s4503_s17 + $0x290] sm:$0xff] (%p3444_p5), %v2973_v42  ;;  %v2975_v43 = vld [vmem:[%s3803_s8 + $0x150] sm:$0xff] (%p3444_p5)  ;;  %v2977_v44 = vld [vmem:[%s3803_s8 + $0x158] sm:$0xff] (%p3444_p5) }
 0x1ce   : > { %2594 = vst.msk [vmem:[%s3803_s8 + $0x3c8] sm:$0xff] %vm2472_vm0, %v2465_v45  ;;  %2593 = vst.msk [vmem:[%s3803_s8 + $0x3c0] sm:$0xff] %vm2472_vm0, %v2464_v46  ;;  %v2979_v45 = vld [vmem:[%s3803_s8 + $0x160] sm:$0xff] (%p3444_p5)  ;;  %v2981_v46 = vld [vmem:[%s3803_s8 + $0x168] sm:$0xff] (%p3444_p5) }
 0x1cf   : > { %v1554_v49 = vpop.permute.xlu1 %1553  ;;  %v1549_v50 = vpop.permute.xlu0 %1548  ;;  %2976 = vst [vmem:[%s4503_s17 + $0x2a0] sm:$0xff] (%p3444_p5), %v2975_v43  ;;  %2978 = vst [vmem:[%s4503_s17 + $0x2b0] sm:$0xff] (%p3444_p5), %v2977_v44  ;;  %v3053_v18 = vld [vmem:[%s3803_s8 + $0x288] sm:$0xff] (%p3444_p5)  ;;  %v3055_v19 = vld [vmem:[%s3803_s8 + $0x290] sm:$0xff] (%p3444_p5) }
 0x1d0   : > { %v2467_v51 = vadd.f32 %v3338_v47, %v1554_v49  ;;  %v2466_v52 = vadd.f32 %v3337_v48, %v1549_v50  ;;  %2980 = vst [vmem:[%s4503_s17 + $0x2c0] sm:$0xff] (%p3444_p5), %v2979_v45  ;;  %v2983_v47 = vld [vmem:[%s3803_s8 + $0x170] sm:$0xff] (%p3444_p5)  ;;  %v2985_v48 = vld [vmem:[%s3803_s8 + $0x178] sm:$0xff] (%p3444_p5)  ;;  %2982 = vst [vmem:[%s4503_s17 + $0x2d0] sm:$0xff] (%p3444_p5), %v2981_v46 }
 0x1d1   : > { %2984 = vst [vmem:[%s4503_s17 + $0x2e0] sm:$0xff] (%p3444_p5), %v2983_v47  ;;  %2986 = vst [vmem:[%s4503_s17 + $0x2f0] sm:$0xff] (%p3444_p5), %v2985_v48  ;;  %v2987_v49 = vld [vmem:[%s3803_s8 + $0x180] sm:$0xff] (%p3444_p5)  ;;  %v2989_v50 = vld [vmem:[%s3803_s8 + $0x188] sm:$0xff] (%p3444_p5) }
 0x1d2   : > { %2596 = vst.msk [vmem:[%s3803_s8 + $0x3d8] sm:$0xff] %vm2472_vm0, %v2467_v51  ;;  %2595 = vst.msk [vmem:[%s3803_s8 + $0x3d0] sm:$0xff] %vm2472_vm0, %v2466_v52  ;;  %v2991_v51 = vld [vmem:[%s3803_s8 + $0x190] sm:$0xff] (%p3444_p5)  ;;  %v2993_v52 = vld [vmem:[%s3803_s8 + $0x198] sm:$0xff] (%p3444_p5) }
 0x1d3   : > { %v1564_v55 = vpop.permute.xlu1 %1563  ;;  %v1559_v56 = vpop.permute.xlu0 %1558  ;;  %2988 = vst [vmem:[%s4503_s17 + $0x300] sm:$0xff] (%p3444_p5), %v2987_v49  ;;  %2990 = vst [vmem:[%s4503_s17 + $0x310] sm:$0xff] (%p3444_p5), %v2989_v50  ;;  %v3057_v20 = vld [vmem:[%s3803_s8 + $0x298] sm:$0xff] (%p3444_p5)  ;;  %v3059_v21 = vld [vmem:[%s3803_s8 + $0x2a0] sm:$0xff] (%p3444_p5) }
 0x1d4   : > { %v2469_v57 = vadd.f32 %v3340_v53, %v1564_v55  ;;  %v2468_v58 = vadd.f32 %v3339_v54, %v1559_v56  ;;  %2607 = sbr.rel (!%p3444_p5) target bundleno = 509 (0x1fd), region = 70  ;;  %2992 = vst [vmem:[%s4503_s17 + $0x320] sm:$0xff] (%p3444_p5), %v2991_v51  ;;  %v2995_v53 = vld [vmem:[%s3803_s8 + $0x1a0] sm:$0xff] (%p3444_p5)  ;;  %v2997_v54 = vld [vmem:[%s3803_s8 + $0x1a8] sm:$0xff] (%p3444_p5)  ;;  %2994 = vst [vmem:[%s4503_s17 + $0x330] sm:$0xff] (%p3444_p5), %v2993_v52 }
 0x1d5   : > { %2996 = vst [vmem:[%s4503_s17 + $0x340] sm:$0xff] (%p3444_p5), %v2995_v53  ;;  %2998 = vst [vmem:[%s4503_s17 + $0x350] sm:$0xff] (%p3444_p5), %v2997_v54  ;;  %v2999_v55 = vld [vmem:[%s3803_s8 + $0x1b0] sm:$0xff] (%p3444_p5)  ;;  %v3001_v56 = vld [vmem:[%s3803_s8 + $0x1b8] sm:$0xff] (%p3444_p5) }
 0x1d6   : > { %2598 = vst.msk [vmem:[%s3803_s8 + $0x3e8] sm:$0xff] %vm2472_vm0, %v2469_v57  ;;  %2597 = vst.msk [vmem:[%s3803_s8 + $0x3e0] sm:$0xff] %vm2472_vm0, %v2468_v58  ;;  %v3003_v57 = vld [vmem:[%s3803_s8 + $0x1c0] sm:$0xff] (%p3444_p5)  ;;  %v3005_v58 = vld [vmem:[%s3803_s8 + $0x1c8] sm:$0xff] (%p3444_p5) }
 0x1d7   : > { %v1574_v61 = vpop.permute.xlu1 %1573  ;;  %v1569_v62 = vpop.permute.xlu0 %1568  ;;  %3000 = vst [vmem:[%s4503_s17 + $0x360] sm:$0xff] (%p3444_p5), %v2999_v55  ;;  %3002 = vst [vmem:[%s4503_s17 + $0x370] sm:$0xff] (%p3444_p5), %v3001_v56  ;;  %v3061_v22 = vld [vmem:[%s3803_s8 + $0x2a8] sm:$0xff] (%p3444_p5)  ;;  %v3063_v23 = vld [vmem:[%s3803_s8 + $0x2b0] sm:$0xff] (%p3444_p5) }
 0x1d8   : > { %v2471_v63 = vadd.f32 %v3342_v59, %v1574_v61  ;;  %v2470_v0 = vadd.f32 %v3341_v60, %v1569_v62  ;;  %3004 = vst [vmem:[%s4503_s17 + $0x380] sm:$0xff] (%p3444_p5), %v3003_v57  ;;  %v3007_v59 = vld [vmem:[%s3803_s8 + $0x1d0] sm:$0xff] (%p3444_p5)  ;;  %v3009_v60 = vld [vmem:[%s3803_s8 + $0x1d8] sm:$0xff] (%p3444_p5)  ;;  %3006 = vst [vmem:[%s4503_s17 + $0x390] sm:$0xff] (%p3444_p5), %v3005_v58 }
 0x1d9   : > { %3008 = vst [vmem:[%s4503_s17 + $0x3a0] sm:$0xff] (%p3444_p5), %v3007_v59  ;;  %3010 = vst [vmem:[%s4503_s17 + $0x3b0] sm:$0xff] (%p3444_p5), %v3009_v60  ;;  %v3011_v61 = vld [vmem:[%s3803_s8 + $0x1e0] sm:$0xff] (%p3444_p5)  ;;  %v3013_v62 = vld [vmem:[%s3803_s8 + $0x1e8] sm:$0xff] (%p3444_p5) }
 0x1da   : > { %2600 = vst.msk [vmem:[%s3803_s8 + $0x3f8] sm:$0xff] %vm2472_vm0, %v2471_v63  ;;  %2599 = vst.msk [vmem:[%s3803_s8 + $0x3f0] sm:$0xff] %vm2472_vm0, %v2470_v0  ;;  %v3015_v63 = vld [vmem:[%s3803_s8 + $0x1f0] sm:$0xff] (%p3444_p5)  ;;  %v3017_v0 = vld [vmem:[%s3803_s8 + $0x1f8] sm:$0xff] (%p3444_p5) }
 0x1db   : > { %3012 = vst [vmem:[%s4503_s17 + $0x3c0] sm:$0xff] %v3011_v61  ;;  %3014 = vst [vmem:[%s4503_s17 + $0x3d0] sm:$0xff] %v3013_v62  ;;  %v3065_v24 = vld [vmem:[%s3803_s8 + $0x2b8] sm:$0xff]  ;;  %v3067_v25 = vld [vmem:[%s3803_s8 + $0x2c0] sm:$0xff] }
 0x1dc   : > { %3016 = vst [vmem:[%s4503_s17 + $0x3e0] sm:$0xff] %v3015_v63  ;;  %3018 = vst [vmem:[%s4503_s17 + $0x3f0] sm:$0xff] %v3017_v0  ;;  %v3069_v26 = vld [vmem:[%s3803_s8 + $0x2c8] sm:$0xff]  ;;  %v3071_v27 = vld [vmem:[%s3803_s8 + $0x2d0] sm:$0xff] }
 0x1dd   : > { %3022 = vst [vmem:[%s4503_s17 + $0x410] sm:$0xff] %v3021_v2  ;;  %3024 = vst [vmem:[%s4503_s17 + $0x420] sm:$0xff] %v3023_v3  ;;  %v3073_v28 = vld [vmem:[%s3803_s8 + $0x2d8] sm:$0xff]  ;;  %v3075_v29 = vld [vmem:[%s3803_s8 + $0x2e0] sm:$0xff] }
 0x1de   : > { %3026 = vst [vmem:[%s4503_s17 + $0x430] sm:$0xff] %v3025_v4  ;;  %3028 = vst [vmem:[%s4503_s17 + $0x440] sm:$0xff] %v3027_v5  ;;  %v3077_v30 = vld [vmem:[%s3803_s8 + $0x2e8] sm:$0xff]  ;;  %v3079_v31 = vld [vmem:[%s3803_s8 + $0x2f0] sm:$0xff] }
 0x1df   : > { %3030 = vst [vmem:[%s4503_s17 + $0x450] sm:$0xff] %v3029_v6  ;;  %3032 = vst [vmem:[%s4503_s17 + $0x460] sm:$0xff] %v3031_v7  ;;  %v3081_v32 = vld [vmem:[%s3803_s8 + $0x2f8] sm:$0xff]  ;;  %v3083_v33 = vld [vmem:[%s3803_s8 + $0x300] sm:$0xff] }
 0x1e0   : > { %3034 = vst [vmem:[%s4503_s17 + $0x470] sm:$0xff] %v3033_v8  ;;  %3036 = vst [vmem:[%s4503_s17 + $0x480] sm:$0xff] %v3035_v9  ;;  %v3085_v34 = vld [vmem:[%s3803_s8 + $0x308] sm:$0xff]  ;;  %v3087_v35 = vld [vmem:[%s3803_s8 + $0x310] sm:$0xff] }
 0x1e1   : > { %3038 = vst [vmem:[%s4503_s17 + $0x490] sm:$0xff] %v3037_v10  ;;  %3040 = vst [vmem:[%s4503_s17 + $0x4a0] sm:$0xff] %v3039_v11  ;;  %v3089_v36 = vld [vmem:[%s3803_s8 + $0x318] sm:$0xff]  ;;  %v3091_v37 = vld [vmem:[%s3803_s8 + $0x320] sm:$0xff] }
 0x1e2   : > { %3042 = vst [vmem:[%s4503_s17 + $0x4b0] sm:$0xff] %v3041_v12  ;;  %3044 = vst [vmem:[%s4503_s17 + $0x4c0] sm:$0xff] %v3043_v13  ;;  %v3093_v38 = vld [vmem:[%s3803_s8 + $0x328] sm:$0xff]  ;;  %v3095_v39 = vld [vmem:[%s3803_s8 + $0x330] sm:$0xff] }
 0x1e3   : > { %3046 = vst [vmem:[%s4503_s17 + $0x4d0] sm:$0xff] %v3045_v14  ;;  %3048 = vst [vmem:[%s4503_s17 + $0x4e0] sm:$0xff] %v3047_v15  ;;  %v3097_v40 = vld [vmem:[%s3803_s8 + $0x338] sm:$0xff]  ;;  %v3099_v41 = vld [vmem:[%s3803_s8 + $0x340] sm:$0xff] }
 0x1e4   : > { %3050 = vst [vmem:[%s4503_s17 + $0x4f0] sm:$0xff] %v3049_v16  ;;  %3052 = vst [vmem:[%s4503_s17 + $0x500] sm:$0xff] %v3051_v17  ;;  %v3101_v42 = vld [vmem:[%s3803_s8 + $0x348] sm:$0xff]  ;;  %v3103_v43 = vld [vmem:[%s3803_s8 + $0x350] sm:$0xff] }
 0x1e5   : > { %3054 = vst [vmem:[%s4503_s17 + $0x510] sm:$0xff] %v3053_v18  ;;  %3056 = vst [vmem:[%s4503_s17 + $0x520] sm:$0xff] %v3055_v19  ;;  %v3105_v44 = vld [vmem:[%s3803_s8 + $0x358] sm:$0xff]  ;;  %v3107_v45 = vld [vmem:[%s3803_s8 + $0x360] sm:$0xff] }
 0x1e6   : > { %3058 = vst [vmem:[%s4503_s17 + $0x530] sm:$0xff] %v3057_v20  ;;  %3060 = vst [vmem:[%s4503_s17 + $0x540] sm:$0xff] %v3059_v21  ;;  %v3109_v46 = vld [vmem:[%s3803_s8 + $0x368] sm:$0xff]  ;;  %v3111_v47 = vld [vmem:[%s3803_s8 + $0x370] sm:$0xff] }
 0x1e7   : > { %3062 = vst [vmem:[%s4503_s17 + $0x550] sm:$0xff] %v3061_v22  ;;  %3064 = vst [vmem:[%s4503_s17 + $0x560] sm:$0xff] %v3063_v23  ;;  %v3113_v48 = vld [vmem:[%s3803_s8 + $0x378] sm:$0xff]  ;;  %v3115_v49 = vld [vmem:[%s3803_s8 + $0x380] sm:$0xff] }
 0x1e8   : > { %3066 = vst [vmem:[%s4503_s17 + $0x570] sm:$0xff] %v3065_v24  ;;  %3068 = vst [vmem:[%s4503_s17 + $0x580] sm:$0xff] %v3067_v25  ;;  %v3117_v50 = vld [vmem:[%s3803_s8 + $0x388] sm:$0xff]  ;;  %v3119_v51 = vld [vmem:[%s3803_s8 + $0x390] sm:$0xff] }
 0x1e9   : > { %3070 = vst [vmem:[%s4503_s17 + $0x590] sm:$0xff] %v3069_v26  ;;  %3072 = vst [vmem:[%s4503_s17 + $0x5a0] sm:$0xff] %v3071_v27  ;;  %v3121_v52 = vld [vmem:[%s3803_s8 + $0x398] sm:$0xff]  ;;  %v3123_v53 = vld [vmem:[%s3803_s8 + $0x3a0] sm:$0xff] }
 0x1ea   : > { %3074 = vst [vmem:[%s4503_s17 + $0x5b0] sm:$0xff] %v3073_v28  ;;  %3076 = vst [vmem:[%s4503_s17 + $0x5c0] sm:$0xff] %v3075_v29  ;;  %v3125_v54 = vld [vmem:[%s3803_s8 + $0x3a8] sm:$0xff]  ;;  %v3127_v55 = vld [vmem:[%s3803_s8 + $0x3b0] sm:$0xff] }
 0x1eb   : > { %3078 = vst [vmem:[%s4503_s17 + $0x5d0] sm:$0xff] %v3077_v30  ;;  %3080 = vst [vmem:[%s4503_s17 + $0x5e0] sm:$0xff] %v3079_v31  ;;  %v3129_v56 = vld [vmem:[%s3803_s8 + $0x3b8] sm:$0xff]  ;;  %v3131_v57 = vld [vmem:[%s3803_s8 + $0x3c0] sm:$0xff] }
 0x1ec   : > { %3082 = vst [vmem:[%s4503_s17 + $0x5f0] sm:$0xff] %v3081_v32  ;;  %3084 = vst [vmem:[%s4503_s17 + $0x600] sm:$0xff] %v3083_v33  ;;  %v3133_v58 = vld [vmem:[%s3803_s8 + $0x3c8] sm:$0xff]  ;;  %v3135_v59 = vld [vmem:[%s3803_s8 + $0x3d0] sm:$0xff] }
 0x1ed   : > { %3086 = vst [vmem:[%s4503_s17 + $0x610] sm:$0xff] %v3085_v34  ;;  %3088 = vst [vmem:[%s4503_s17 + $0x620] sm:$0xff] %v3087_v35  ;;  %v3137_v60 = vld [vmem:[%s3803_s8 + $0x3d8] sm:$0xff]  ;;  %v3139_v61 = vld [vmem:[%s3803_s8 + $0x3e0] sm:$0xff] }
 0x1ee   : > { %3090 = vst [vmem:[%s4503_s17 + $0x630] sm:$0xff] %v3089_v36  ;;  %3092 = vst [vmem:[%s4503_s17 + $0x640] sm:$0xff] %v3091_v37  ;;  %v3141_v62 = vld [vmem:[%s3803_s8 + $0x3e8] sm:$0xff]  ;;  %v3143_v63 = vld [vmem:[%s3803_s8 + $0x3f0] sm:$0xff] }
 0x1ef   : > { %3094 = vst [vmem:[%s4503_s17 + $0x650] sm:$0xff] %v3093_v38  ;;  %3096 = vst [vmem:[%s4503_s17 + $0x660] sm:$0xff] %v3095_v39  ;;  %v3145_v0 = vld [vmem:[%s3803_s8 + $0x3f8] sm:$0xff] }
 0x1f0   : > { %3098 = vst [vmem:[%s4503_s17 + $0x670] sm:$0xff] %v3097_v40  ;;  %3100 = vst [vmem:[%s4503_s17 + $0x680] sm:$0xff] %v3099_v41 }
 0x1f1   : > { %3102 = vst [vmem:[%s4503_s17 + $0x690] sm:$0xff] %v3101_v42  ;;  %3104 = vst [vmem:[%s4503_s17 + $0x6a0] sm:$0xff] %v3103_v43 }
 0x1f2   : > { %3106 = vst [vmem:[%s4503_s17 + $0x6b0] sm:$0xff] %v3105_v44  ;;  %3108 = vst [vmem:[%s4503_s17 + $0x6c0] sm:$0xff] %v3107_v45 }
 0x1f3   : > { %3110 = vst [vmem:[%s4503_s17 + $0x6d0] sm:$0xff] %v3109_v46  ;;  %3112 = vst [vmem:[%s4503_s17 + $0x6e0] sm:$0xff] %v3111_v47 }
 0x1f4   : > { %3114 = vst [vmem:[%s4503_s17 + $0x6f0] sm:$0xff] %v3113_v48  ;;  %3116 = vst [vmem:[%s4503_s17 + $0x700] sm:$0xff] %v3115_v49 }
 0x1f5   : > { %3118 = vst [vmem:[%s4503_s17 + $0x710] sm:$0xff] %v3117_v50  ;;  %3120 = vst [vmem:[%s4503_s17 + $0x720] sm:$0xff] %v3119_v51 }
 0x1f6   : > { %3122 = vst [vmem:[%s4503_s17 + $0x730] sm:$0xff] %v3121_v52  ;;  %3124 = vst [vmem:[%s4503_s17 + $0x740] sm:$0xff] %v3123_v53 }
 0x1f7   : > { %3126 = vst [vmem:[%s4503_s17 + $0x750] sm:$0xff] %v3125_v54  ;;  %3128 = vst [vmem:[%s4503_s17 + $0x760] sm:$0xff] %v3127_v55 }
 0x1f8   : > { %3130 = vst [vmem:[%s4503_s17 + $0x770] sm:$0xff] %v3129_v56  ;;  %3132 = vst [vmem:[%s4503_s17 + $0x780] sm:$0xff] %v3131_v57 }
 0x1f9   : > { %3134 = vst [vmem:[%s4503_s17 + $0x790] sm:$0xff] %v3133_v58  ;;  %3136 = vst [vmem:[%s4503_s17 + $0x7a0] sm:$0xff] %v3135_v59 }
 0x1fa   : > { %3138 = vst [vmem:[%s4503_s17 + $0x7b0] sm:$0xff] %v3137_v60  ;;  %3140 = vst [vmem:[%s4503_s17 + $0x7c0] sm:$0xff] %v3139_v61 }
 0x1fb   : > { %3142 = vst [vmem:[%s4503_s17 + $0x7d0] sm:$0xff] %v3141_v62  ;;  %3144 = vst [vmem:[%s4503_s17 + $0x7e0] sm:$0xff] %v3143_v63 }
 0x1fc   : > { %3146 = vst [vmem:[%s4503_s17 + $0x7f0] sm:$0xff] %v3145_v0 }
 0x1fd PF: > { %p9_p10 = scmp.ge.s32.totalorder %s3431_s13, 4   ;;  %s4772_s9 = smov %s3392_s10 }
 0x1fe   : > { %s4773_s10 = smov %s3442_s16  ;;  %s4774_s11 = smov %s3431_s13 }
 0x1ff   :  { %11 = sbr.rel (!%p9_p10) target bundleno = 2 (0x2), region = 139 }

</bundles_post_ra>
